<compile_context>
chip_gen: v7x
topology: tpu7x:2x2x1
jax: 0.10.0
libtpu: 0.0.40
codegen_flags: <defaults>
</compile_context>

<pallas_src>
import functools

import jax
import jax.numpy as jnp
import numpy as np
from jax import lax
from jax.experimental import pallas as pl
from jax.experimental.pallas import tpu as pltpu


# ----------------------------------------------------------------------------
# Fused multi-layer S4D residual kernel over one (T, B, H_tile) block.
#
#   per layer l, per timestep t:
#     h_t = Abar * h_{t-1} + Bbar * x_t          (complex, per (N, H) channel)
#     y_t = Re( sum_n Ceff[l, n, h] * h_t[n, h] )   (2x factor folded into Ceff)
#     x_t <- x_t + y_t                           (residual; feeds layer l+1)
#
# State (h_re/h_im, one per layer) lives in VMEM scratch and persists across
# the sequential ("arbitrary") time-chunk grid axis; it is re-zeroed when a new
# H tile starts (time-chunk index == 0).
# ----------------------------------------------------------------------------
def _fused_s4d_kernel(x_ref, are_ref, aim_ref, bre_ref, bim_ref,
                      cre_ref, cim_ref, o_ref, h_re, h_im, *, unroll):
    t_chunk = pl.program_id(1)

    @pl.when(t_chunk == 0)
    def _():
        h_re[...] = jnp.zeros_like(h_re)
        h_im[...] = jnp.zeros_like(h_im)

    # Hoist parameter loads out of the time loop (JAX does not CSE broadcasts).
    are = are_ref[...]          # (N, Ht)
    aim = aim_ref[...]
    bre = bre_ref[...]
    bim = bim_ref[...]
    cre = cre_ref[...]          # (num_layers, N, Ht)  -- 2.0 readout factor folded in
    cim = cim_ref[...]

    num_layers = cre_ref.shape[0]
    T = x_ref.shape[0]

    # Carry the per-layer state through the in-kernel time loop in registers;
    # write it back to the persistent VMEM scratch once per chunk.
    init_carry = (tuple(h_re[l] for l in range(num_layers)),
                  tuple(h_im[l] for l in range(num_layers)))

    def step(i, carry):
        hs_re, hs_im = carry
        xt = x_ref[i]                              # (B, Ht)
        new_re, new_im = [], []
        for l in range(num_layers):                # static python loop -> unrolled
            xb = xt[:, None, :]                    # (B, 1, Ht)
            hre, him = hs_re[l], hs_im[l]          # (B, N, Ht)
            nre = are * hre - aim * him + xb * bre
            nim = are * him + aim * hre + xb * bim
            # Re(C * h); N sits on the sublane axis -> cheap XLU cross-sublane reduce.
            y = jnp.sum(cre[l] * nre - cim[l] * nim, axis=1)   # (B, Ht)
            xt = xt + y                            # residual; feeds next layer
            new_re.append(nre)
            new_im.append(nim)
        o_ref[i] = xt.astype(o_ref.dtype)
        return (tuple(new_re), tuple(new_im))

    final_re, final_im = lax.fori_loop(0, T, step, init_carry, unroll=unroll)

    for l in range(num_layers):
        h_re[l] = final_re[l]
        h_im[l] = final_im[l]


def _pad_axis(a, axis, target):
    pad = target - a.shape[axis]
    if pad <= 0:
        return a
    widths = [(0, 0)] * a.ndim
    widths[axis] = (0, pad)
    return jnp.pad(a, widths)


def model_forward(x, params, *, time_chunk=256, h_tile=128, unroll=8):
    """Applies all fused S4D residual layers.  x: (L, B, H) float32, time-major."""
    L, B, H = x.shape
    c_re, c_im = params["c_re"], params["c_im"]
    num_layers, N, _ = c_re.shape

    # Lane-dense layout: pad / tile H to multiples of 128 lanes.
    Hp = pl.cdiv(H, h_tile) * h_tile
    # Time chunking amortizes the per-grid-step overhead; pad L up to a multiple.
    T = min(time_chunk, L)
    Lp = pl.cdiv(L, T) * T
    unroll = max(1, min(unroll, T))

    xp = _pad_axis(_pad_axis(x, 2, Hp), 0, Lp)
    are = _pad_axis(params["abar_re"], 1, Hp)
    aim = _pad_axis(params["abar_im"], 1, Hp)
    bre = _pad_axis(params["bbar_re"], 1, Hp)
    bim = _pad_axis(params["bbar_im"], 1, Hp)
    cre = _pad_axis(c_re, 2, Hp)
    cim = _pad_axis(c_im, 2, Hp)

    seq_spec = pl.BlockSpec((T, B, h_tile), lambda h, t: (t, 0, h))
    ab_spec = pl.BlockSpec((N, h_tile), lambda h, t: (0, h))
    c_spec = pl.BlockSpec((num_layers, N, h_tile), lambda h, t: (0, 0, h))

    out = pl.pallas_call(
        functools.partial(_fused_s4d_kernel, unroll=unroll),
        out_shape=jax.ShapeDtypeStruct((Lp, B, Hp), x.dtype),
        grid_spec=pltpu.PrefetchScalarGridSpec(
            num_scalar_prefetch=0,
            grid=(Hp // h_tile, Lp // T),
            in_specs=[seq_spec, ab_spec, ab_spec, ab_spec, ab_spec,
                      c_spec, c_spec],
            out_specs=seq_spec,
            scratch_shapes=[pltpu.VMEM((num_layers, B, N, h_tile), jnp.float32),
                            pltpu.VMEM((num_layers, B, N, h_tile), jnp.float32)],
        ),
        compiler_params=pltpu.CompilerParams(
            # H tiles are independent channels (shardable across v7x's 2 TCs);
            # the time axis carries the recurrence -> must stay sequential.
            dimension_semantics=("parallel", "arbitrary"),
            # Allow large time chunks (scoped default is 16/32 MiB).
            vmem_limit_bytes=64 * 1024 * 1024,
        ),
    )(xp, are, aim, bre, bim, cre, cim)

    return out[:L, :, :H]


# ----------------------------------------------------------------------------
# Parameter setup (plain JAX glue): deterministic init of the registered
# `log_A_real`, `A_imag` parameters + per-layer C; ZOH discretization.
# ----------------------------------------------------------------------------
def init_model_params(key, num_layers, H, N, dt=0.01):
    # Model.register('log_A_real', ...) / Model.register('A_imag', ...)
    log_A_real = jnp.log(0.5 * jnp.ones((N, H), jnp.float32))
    A_imag = (jnp.pi * jnp.arange(N, dtype=jnp.float32))[:, None] \
             * jnp.ones((1, H), jnp.float32)

    A = -jnp.exp(log_A_real) + 1j * A_imag          # (N, H) complex64
    Abar = jnp.exp(dt * A)                          # ZOH state transition
    Bbar = (Abar - 1.0) / A                         # ZOH input (B = 1)

    keys = jax.random.split(key, num_layers)
    C = jnp.stack([jax.random.normal(k, (2, N, H), jnp.float32) * (N ** -0.5)
                   for k in keys])                  # (num_layers, 2, N, H)

    return dict(
        abar_re=jnp.real(Abar).astype(jnp.float32),
        abar_im=jnp.imag(Abar).astype(jnp.float32),
        bbar_re=jnp.real(Bbar).astype(jnp.float32),
        bbar_im=jnp.imag(Bbar).astype(jnp.float32),
        # Readout factor 2 (from y = 2*Re(C h)) folded into C at init time.
        c_re=2.0 * C[:, 0],
        c_im=2.0 * C[:, 1],
    )


def reference_forward(x, params):
    """Pure-JAX reference: per-layer sequential complex scan."""
    A = (params["abar_re"] + 1j * params["abar_im"]).astype(jnp.complex64)
    Bb = (params["bbar_re"] + 1j * params["bbar_im"]).astype(jnp.complex64)
    num_layers = params["c_re"].shape[0]
    Bsz = x.shape[1]
    N, H = A.shape
    for l in range(num_layers):
        C = (params["c_re"][l] + 1j * params["c_im"][l]).astype(jnp.complex64)

        def step(h, xt, C=C):
            h = A[None] * h + xt[:, None, :] * Bb[None]
            y = jnp.real(jnp.sum(C[None] * h, axis=1))
            return h, xt + y

        h0 = jnp.zeros((Bsz, N, H), jnp.complex64)
        _, x = lax.scan(step, h0, x)
    return x


if __name__ == "__main__":
    B, L, H, N = 2, 8, 32, 4          # batch, seq, hidden, SSM state size
    num_layers = 2

    key = jax.random.PRNGKey(0)
    k_x, k_p = jax.random.split(key)

    # layout: (L, B, H) time-major
    x = jax.random.normal(k_x, (L, B, H), dtype=jnp.float32)
    params = init_model_params(k_p, num_layers=num_layers, H=H, N=N)

    out = model_forward(x, params)
    out = jax.block_until_ready(out)
    assert out.shape == (L, B, H) and out.dtype == jnp.float32

    ref = jax.block_until_ready(reference_forward(x, params))
    max_err = float(np.max(np.abs(np.asarray(out) - np.asarray(ref))))
    assert np.allclose(np.asarray(out), np.asarray(ref), rtol=1e-3, atol=1e-3), max_err

    print("KERNEL_OK")
</pallas_src>

<mosaic_0001>
module attributes {stable_mosaic.version = 11 : i64} {
  func.func @_fused_s4d_kernel(%arg0: i32, %arg1: i32, %arg2: memref<8x2x128xf32, #tpu.memory_space<vmem>>, %arg3: memref<4x128xf32, #tpu.memory_space<vmem>>, %arg4: memref<4x128xf32, #tpu.memory_space<vmem>>, %arg5: memref<4x128xf32, #tpu.memory_space<vmem>>, %arg6: memref<4x128xf32, #tpu.memory_space<vmem>>, %arg7: memref<2x4x128xf32, #tpu.memory_space<vmem>>, %arg8: memref<2x4x128xf32, #tpu.memory_space<vmem>>, %arg9: memref<8x2x128xf32, #tpu.memory_space<vmem>>, %arg10: memref<2x2x4x128xf32, #tpu.memory_space<vmem>>, %arg11: memref<2x2x4x128xf32, #tpu.memory_space<vmem>>) attributes {dimension_semantics = [#tpu.dimension_semantics<parallel>, #tpu.dimension_semantics<arbitrary>], iteration_bounds = array<i64: 1, 1>, scalar_prefetch = 0 : i64, scratch_operands = 2 : i64, tpu.core_type = #tpu.core_type<tc>, window_params = [{transform_indices = @transform_0, window_bounds = array<i64: 8, 2, 128>}, {transform_indices = @transform_1, window_bounds = array<i64: 4, 128>}, {transform_indices = @transform_2, window_bounds = array<i64: 4, 128>}, {transform_indices = @transform_3, window_bounds = array<i64: 4, 128>}, {transform_indices = @transform_4, window_bounds = array<i64: 4, 128>}, {transform_indices = @transform_5, window_bounds = array<i64: 2, 4, 128>}, {transform_indices = @transform_6, window_bounds = array<i64: 2, 4, 128>}, {transform_indices = @transform_7, window_bounds = array<i64: 8, 2, 128>}]} {
    %c0_i32 = arith.constant 0 : i32
    %0 = arith.cmpi eq, %arg1, %c0_i32 : i32
    %1 = arith.extui %0 : i1 to i32
    %c0_i32_0 = arith.constant 0 : i32
    %2 = arith.cmpi ne, %1, %c0_i32_0 : i32
    scf.if %2 {
      %cst_93 = arith.constant 0.000000e+00 : f32
      %693 = vector.broadcast %cst_93 : f32 to vector<2x2x4x128xf32>
      %c0_94 = arith.constant 0 : index
      %c0_95 = arith.constant 0 : index
      %c0_96 = arith.constant 0 : index
      %c0_97 = arith.constant 0 : index
      %694 = vector.load %arg10[%c0_94, %c0_95, %c0_96, %c0_97] : memref<2x2x4x128xf32, #tpu.memory_space<vmem>>, vector<2x2x4x128xf32>
      tpu.vector_store %arg10[%c0_94, %c0_95, %c0_96, %c0_97], %693 {strides = array<i32>} : memref<2x2x4x128xf32, #tpu.memory_space<vmem>>, vector<2x2x4x128xf32>,
      %cst_98 = arith.constant 0.000000e+00 : f32
      %695 = vector.broadcast %cst_98 : f32 to vector<2x2x4x128xf32>
      %c0_99 = arith.constant 0 : index
      %c0_100 = arith.constant 0 : index
      %c0_101 = arith.constant 0 : index
      %c0_102 = arith.constant 0 : index
      %696 = vector.load %arg11[%c0_99, %c0_100, %c0_101, %c0_102] : memref<2x2x4x128xf32, #tpu.memory_space<vmem>>, vector<2x2x4x128xf32>
      tpu.vector_store %arg11[%c0_99, %c0_100, %c0_101, %c0_102], %695 {strides = array<i32>} : memref<2x2x4x128xf32, #tpu.memory_space<vmem>>, vector<2x2x4x128xf32>,
    } else {
    }
    %c0 = arith.constant 0 : index
    %c0_1 = arith.constant 0 : index
    %3 = vector.load %arg3[%c0, %c0_1] : memref<4x128xf32, #tpu.memory_space<vmem>>, vector<4x128xf32>
    %c0_2 = arith.constant 0 : index
    %c0_3 = arith.constant 0 : index
    %4 = vector.load %arg4[%c0_2, %c0_3] : memref<4x128xf32, #tpu.memory_space<vmem>>, vector<4x128xf32>
    %c0_4 = arith.constant 0 : index
    %c0_5 = arith.constant 0 : index
    %5 = vector.load %arg5[%c0_4, %c0_5] : memref<4x128xf32, #tpu.memory_space<vmem>>, vector<4x128xf32>
    %c0_6 = arith.constant 0 : index
    %c0_7 = arith.constant 0 : index
    %6 = vector.load %arg6[%c0_6, %c0_7] : memref<4x128xf32, #tpu.memory_space<vmem>>, vector<4x128xf32>
    %c0_8 = arith.constant 0 : index
    %c0_9 = arith.constant 0 : index
    %c0_10 = arith.constant 0 : index
    %7 = vector.load %arg7[%c0_8, %c0_9, %c0_10] : memref<2x4x128xf32, #tpu.memory_space<vmem>>, vector<2x4x128xf32>
    %c0_11 = arith.constant 0 : index
    %c0_12 = arith.constant 0 : index
    %c0_13 = arith.constant 0 : index
    %8 = vector.load %arg8[%c0_11, %c0_12, %c0_13] : memref<2x4x128xf32, #tpu.memory_space<vmem>>, vector<2x4x128xf32>
    %c0_14 = arith.constant 0 : index
    %c0_15 = arith.constant 0 : index
    %c0_16 = arith.constant 0 : index
    %c0_17 = arith.constant 0 : index
    %9 = vector.load %arg10[%c0_14, %c0_15, %c0_16, %c0_17] : memref<2x2x4x128xf32, #tpu.memory_space<vmem>>, vector<1x2x4x128xf32>
    %10 = vector.shape_cast %9 : vector<1x2x4x128xf32> to vector<2x4x128xf32>
    %c1 = arith.constant 1 : index
    %c0_18 = arith.constant 0 : index
    %c0_19 = arith.constant 0 : index
    %c0_20 = arith.constant 0 : index
    %11 = vector.load %arg10[%c1, %c0_18, %c0_19, %c0_20] : memref<2x2x4x128xf32, #tpu.memory_space<vmem>>, vector<1x2x4x128xf32>
    %12 = vector.shape_cast %11 : vector<1x2x4x128xf32> to vector<2x4x128xf32>
    %c0_21 = arith.constant 0 : index
    %c0_22 = arith.constant 0 : index
    %c0_23 = arith.constant 0 : index
    %c0_24 = arith.constant 0 : index
    %13 = vector.load %arg11[%c0_21, %c0_22, %c0_23, %c0_24] : memref<2x2x4x128xf32, #tpu.memory_space<vmem>>, vector<1x2x4x128xf32>
    %14 = vector.shape_cast %13 : vector<1x2x4x128xf32> to vector<2x4x128xf32>
    %c1_25 = arith.constant 1 : index
    %c0_26 = arith.constant 0 : index
    %c0_27 = arith.constant 0 : index
    %c0_28 = arith.constant 0 : index
    %15 = vector.load %arg11[%c1_25, %c0_26, %c0_27, %c0_28] : memref<2x2x4x128xf32, #tpu.memory_space<vmem>>, vector<1x2x4x128xf32>
    %16 = vector.shape_cast %15 : vector<1x2x4x128xf32> to vector<2x4x128xf32>
    %c0_i32_29 = arith.constant 0 : i32
    %17 = arith.index_cast %c0_i32_29 : i32 to index
    %c0_30 = arith.constant 0 : index
    %c0_31 = arith.constant 0 : index
    %18 = vector.load %arg2[%17, %c0_30, %c0_31] : memref<8x2x128xf32, #tpu.memory_space<vmem>>, vector<1x2x128xf32>
    %19 = vector.shape_cast %18 : vector<1x2x128xf32> to vector<2x128xf32>
    %20 = vector.shape_cast %19 : vector<2x128xf32> to vector<2x1x128xf32>
    %21 = vector.shape_cast %3 : vector<4x128xf32> to vector<1x4x128xf32>
    %22 = vector.broadcast %21 : vector<1x4x128xf32> to vector<2x4x128xf32>
    %23 = arith.mulf %22, %10 : vector<2x4x128xf32>
    %24 = vector.shape_cast %4 : vector<4x128xf32> to vector<1x4x128xf32>
    %25 = vector.broadcast %24 : vector<1x4x128xf32> to vector<2x4x128xf32>
    %26 = arith.mulf %25, %14 : vector<2x4x128xf32>
    %27 = arith.subf %23, %26 : vector<2x4x128xf32>
    %28 = vector.shape_cast %5 : vector<4x128xf32> to vector<1x4x128xf32>
    %29 = vector.broadcast %20 : vector<2x1x128xf32> to vector<2x4x128xf32>
    %30 = vector.broadcast %28 : vector<1x4x128xf32> to vector<2x4x128xf32>
    %31 = arith.mulf %29, %30 : vector<2x4x128xf32>
    %32 = arith.addf %27, %31 : vector<2x4x128xf32>
    %33 = vector.shape_cast %3 : vector<4x128xf32> to vector<1x4x128xf32>
    %34 = vector.broadcast %33 : vector<1x4x128xf32> to vector<2x4x128xf32>
    %35 = arith.mulf %34, %14 : vector<2x4x128xf32>
    %36 = vector.shape_cast %4 : vector<4x128xf32> to vector<1x4x128xf32>
    %37 = vector.broadcast %36 : vector<1x4x128xf32> to vector<2x4x128xf32>
    %38 = arith.mulf %37, %10 : vector<2x4x128xf32>
    %39 = arith.addf %35, %38 : vector<2x4x128xf32>
    %40 = vector.shape_cast %6 : vector<4x128xf32> to vector<1x4x128xf32>
    %41 = vector.broadcast %20 : vector<2x1x128xf32> to vector<2x4x128xf32>
    %42 = vector.broadcast %40 : vector<1x4x128xf32> to vector<2x4x128xf32>
    %43 = arith.mulf %41, %42 : vector<2x4x128xf32>
    %44 = arith.addf %39, %43 : vector<2x4x128xf32>
    %45 = vector.extract_strided_slice %7 {offsets = [0, 0, 0], sizes = [1, 4, 128], strides = [1, 1, 1]} : vector<2x4x128xf32> to vector<1x4x128xf32>
    %46 = vector.shape_cast %45 : vector<1x4x128xf32> to vector<4x128xf32>
    %47 = vector.shape_cast %46 : vector<4x128xf32> to vector<1x4x128xf32>
    %48 = vector.broadcast %47 : vector<1x4x128xf32> to vector<2x4x128xf32>
    %49 = arith.mulf %48, %32 : vector<2x4x128xf32>
    %50 = vector.extract_strided_slice %8 {offsets = [0, 0, 0], sizes = [1, 4, 128], strides = [1, 1, 1]} : vector<2x4x128xf32> to vector<1x4x128xf32>
    %51 = vector.shape_cast %50 : vector<1x4x128xf32> to vector<4x128xf32>
    %52 = vector.shape_cast %51 : vector<4x128xf32> to vector<1x4x128xf32>
    %53 = vector.broadcast %52 : vector<1x4x128xf32> to vector<2x4x128xf32>
    %54 = arith.mulf %53, %44 : vector<2x4x128xf32>
    %55 = arith.subf %49, %54 : vector<2x4x128xf32>
    %cst = arith.constant dense<0.000000e+00> : vector<2x128xf32>
    %56 = vector.multi_reduction <add>, %55, %cst [1] : vector<2x4x128xf32> to vector<2x128xf32>
    %57 = arith.addf %19, %56 : vector<2x128xf32>
    %58 = vector.shape_cast %57 : vector<2x128xf32> to vector<2x1x128xf32>
    %59 = vector.shape_cast %3 : vector<4x128xf32> to vector<1x4x128xf32>
    %60 = vector.broadcast %59 : vector<1x4x128xf32> to vector<2x4x128xf32>
    %61 = arith.mulf %60, %12 : vector<2x4x128xf32>
    %62 = vector.shape_cast %4 : vector<4x128xf32> to vector<1x4x128xf32>
    %63 = vector.broadcast %62 : vector<1x4x128xf32> to vector<2x4x128xf32>
    %64 = arith.mulf %63, %16 : vector<2x4x128xf32>
    %65 = arith.subf %61, %64 : vector<2x4x128xf32>
    %66 = vector.shape_cast %5 : vector<4x128xf32> to vector<1x4x128xf32>
    %67 = vector.broadcast %58 : vector<2x1x128xf32> to vector<2x4x128xf32>
    %68 = vector.broadcast %66 : vector<1x4x128xf32> to vector<2x4x128xf32>
    %69 = arith.mulf %67, %68 : vector<2x4x128xf32>
    %70 = arith.addf %65, %69 : vector<2x4x128xf32>
    %71 = vector.shape_cast %3 : vector<4x128xf32> to vector<1x4x128xf32>
    %72 = vector.broadcast %71 : vector<1x4x128xf32> to vector<2x4x128xf32>
    %73 = arith.mulf %72, %16 : vector<2x4x128xf32>
    %74 = vector.shape_cast %4 : vector<4x128xf32> to vector<1x4x128xf32>
    %75 = vector.broadcast %74 : vector<1x4x128xf32> to vector<2x4x128xf32>
    %76 = arith.mulf %75, %12 : vector<2x4x128xf32>
    %77 = arith.addf %73, %76 : vector<2x4x128xf32>
    %78 = vector.shape_cast %6 : vector<4x128xf32> to vector<1x4x128xf32>
    %79 = vector.broadcast %58 : vector<2x1x128xf32> to vector<2x4x128xf32>
    %80 = vector.broadcast %78 : vector<1x4x128xf32> to vector<2x4x128xf32>
    %81 = arith.mulf %79, %80 : vector<2x4x128xf32>
    %82 = arith.addf %77, %81 : vector<2x4x128xf32>
    %83 = vector.extract_strided_slice %7 {offsets = [1, 0, 0], sizes = [1, 4, 128], strides = [1, 1, 1]} : vector<2x4x128xf32> to vector<1x4x128xf32>
    %84 = vector.shape_cast %83 : vector<1x4x128xf32> to vector<4x128xf32>
    %85 = vector.shape_cast %84 : vector<4x128xf32> to vector<1x4x128xf32>
    %86 = vector.broadcast %85 : vector<1x4x128xf32> to vector<2x4x128xf32>
    %87 = arith.mulf %86, %70 : vector<2x4x128xf32>
    %88 = vector.extract_strided_slice %8 {offsets = [1, 0, 0], sizes = [1, 4, 128], strides = [1, 1, 1]} : vector<2x4x128xf32> to vector<1x4x128xf32>
    %89 = vector.shape_cast %88 : vector<1x4x128xf32> to vector<4x128xf32>
    %90 = vector.shape_cast %89 : vector<4x128xf32> to vector<1x4x128xf32>
    %91 = vector.broadcast %90 : vector<1x4x128xf32> to vector<2x4x128xf32>
    %92 = arith.mulf %91, %82 : vector<2x4x128xf32>
    %93 = arith.subf %87, %92 : vector<2x4x128xf32>
    %cst_32 = arith.constant dense<0.000000e+00> : vector<2x128xf32>
    %94 = vector.multi_reduction <add>, %93, %cst_32 [1] : vector<2x4x128xf32> to vector<2x128xf32>
    %95 = arith.addf %57, %94 : vector<2x128xf32>
    %96 = arith.index_cast %c0_i32_29 : i32 to index
    %c0_33 = arith.constant 0 : index
    %c0_34 = arith.constant 0 : index
    %97 = vector.load %arg9[%96, %c0_33, %c0_34] : memref<8x2x128xf32, #tpu.memory_space<vmem>>, vector<1x2x128xf32>
    %98 = vector.shape_cast %97 : vector<1x2x128xf32> to vector<2x128xf32>
    %99 = vector.shape_cast %95 : vector<2x128xf32> to vector<1x2x128xf32>
    tpu.vector_store %arg9[%96, %c0_33, %c0_34], %99 {strides = array<i32>} : memref<8x2x128xf32, #tpu.memory_space<vmem>>, vector<1x2x128xf32>,
    %c1_i32 = arith.constant 1 : i32
    %100 = arith.index_cast %c1_i32 : i32 to index
    %c0_35 = arith.constant 0 : index
    %c0_36 = arith.constant 0 : index
    %101 = vector.load %arg2[%100, %c0_35, %c0_36] : memref<8x2x128xf32, #tpu.memory_space<vmem>>, vector<1x2x128xf32>
    %102 = vector.shape_cast %101 : vector<1x2x128xf32> to vector<2x128xf32>
    %103 = vector.shape_cast %102 : vector<2x128xf32> to vector<2x1x128xf32>
    %104 = vector.shape_cast %3 : vector<4x128xf32> to vector<1x4x128xf32>
    %105 = vector.broadcast %104 : vector<1x4x128xf32> to vector<2x4x128xf32>
    %106 = arith.mulf %105, %32 : vector<2x4x128xf32>
    %107 = vector.shape_cast %4 : vector<4x128xf32> to vector<1x4x128xf32>
    %108 = vector.broadcast %107 : vector<1x4x128xf32> to vector<2x4x128xf32>
    %109 = arith.mulf %108, %44 : vector<2x4x128xf32>
    %110 = arith.subf %106, %109 : vector<2x4x128xf32>
    %111 = vector.shape_cast %5 : vector<4x128xf32> to vector<1x4x128xf32>
    %112 = vector.broadcast %103 : vector<2x1x128xf32> to vector<2x4x128xf32>
    %113 = vector.broadcast %111 : vector<1x4x128xf32> to vector<2x4x128xf32>
    %114 = arith.mulf %112, %113 : vector<2x4x128xf32>
    %115 = arith.addf %110, %114 : vector<2x4x128xf32>
    %116 = vector.shape_cast %3 : vector<4x128xf32> to vector<1x4x128xf32>
    %117 = vector.broadcast %116 : vector<1x4x128xf32> to vector<2x4x128xf32>
    %118 = arith.mulf %117, %44 : vector<2x4x128xf32>
    %119 = vector.shape_cast %4 : vector<4x128xf32> to vector<1x4x128xf32>
    %120 = vector.broadcast %119 : vector<1x4x128xf32> to vector<2x4x128xf32>
    %121 = arith.mulf %120, %32 : vector<2x4x128xf32>
    %122 = arith.addf %118, %121 : vector<2x4x128xf32>
    %123 = vector.shape_cast %6 : vector<4x128xf32> to vector<1x4x128xf32>
    %124 = vector.broadcast %103 : vector<2x1x128xf32> to vector<2x4x128xf32>
    %125 = vector.broadcast %123 : vector<1x4x128xf32> to vector<2x4x128xf32>
    %126 = arith.mulf %124, %125 : vector<2x4x128xf32>
    %127 = arith.addf %122, %126 : vector<2x4x128xf32>
    %128 = vector.extract_strided_slice %7 {offsets = [0, 0, 0], sizes = [1, 4, 128], strides = [1, 1, 1]} : vector<2x4x128xf32> to vector<1x4x128xf32>
    %129 = vector.shape_cast %128 : vector<1x4x128xf32> to vector<4x128xf32>
    %130 = vector.shape_cast %129 : vector<4x128xf32> to vector<1x4x128xf32>
    %131 = vector.broadcast %130 : vector<1x4x128xf32> to vector<2x4x128xf32>
    %132 = arith.mulf %131, %115 : vector<2x4x128xf32>
    %133 = vector.extract_strided_slice %8 {offsets = [0, 0, 0], sizes = [1, 4, 128], strides = [1, 1, 1]} : vector<2x4x128xf32> to vector<1x4x128xf32>
    %134 = vector.shape_cast %133 : vector<1x4x128xf32> to vector<4x128xf32>
    %135 = vector.shape_cast %134 : vector<4x128xf32> to vector<1x4x128xf32>
    %136 = vector.broadcast %135 : vector<1x4x128xf32> to vector<2x4x128xf32>
    %137 = arith.mulf %136, %127 : vector<2x4x128xf32>
    %138 = arith.subf %132, %137 : vector<2x4x128xf32>
    %cst_37 = arith.constant dense<0.000000e+00> : vector<2x128xf32>
    %139 = vector.multi_reduction <add>, %138, %cst_37 [1] : vector<2x4x128xf32> to vector<2x128xf32>
    %140 = arith.addf %102, %139 : vector<2x128xf32>
    %141 = vector.shape_cast %140 : vector<2x128xf32> to vector<2x1x128xf32>
    %142 = vector.shape_cast %3 : vector<4x128xf32> to vector<1x4x128xf32>
    %143 = vector.broadcast %142 : vector<1x4x128xf32> to vector<2x4x128xf32>
    %144 = arith.mulf %143, %70 : vector<2x4x128xf32>
    %145 = vector.shape_cast %4 : vector<4x128xf32> to vector<1x4x128xf32>
    %146 = vector.broadcast %145 : vector<1x4x128xf32> to vector<2x4x128xf32>
    %147 = arith.mulf %146, %82 : vector<2x4x128xf32>
    %148 = arith.subf %144, %147 : vector<2x4x128xf32>
    %149 = vector.shape_cast %5 : vector<4x128xf32> to vector<1x4x128xf32>
    %150 = vector.broadcast %141 : vector<2x1x128xf32> to vector<2x4x128xf32>
    %151 = vector.broadcast %149 : vector<1x4x128xf32> to vector<2x4x128xf32>
    %152 = arith.mulf %150, %151 : vector<2x4x128xf32>
    %153 = arith.addf %148, %152 : vector<2x4x128xf32>
    %154 = vector.shape_cast %3 : vector<4x128xf32> to vector<1x4x128xf32>
    %155 = vector.broadcast %154 : vector<1x4x128xf32> to vector<2x4x128xf32>
    %156 = arith.mulf %155, %82 : vector<2x4x128xf32>
    %157 = vector.shape_cast %4 : vector<4x128xf32> to vector<1x4x128xf32>
    %158 = vector.broadcast %157 : vector<1x4x128xf32> to vector<2x4x128xf32>
    %159 = arith.mulf %158, %70 : vector<2x4x128xf32>
    %160 = arith.addf %156, %159 : vector<2x4x128xf32>
    %161 = vector.shape_cast %6 : vector<4x128xf32> to vector<1x4x128xf32>
    %162 = vector.broadcast %141 : vector<2x1x128xf32> to vector<2x4x128xf32>
    %163 = vector.broadcast %161 : vector<1x4x128xf32> to vector<2x4x128xf32>
    %164 = arith.mulf %162, %163 : vector<2x4x128xf32>
    %165 = arith.addf %160, %164 : vector<2x4x128xf32>
    %166 = vector.extract_strided_slice %7 {offsets = [1, 0, 0], sizes = [1, 4, 128], strides = [1, 1, 1]} : vector<2x4x128xf32> to vector<1x4x128xf32>
    %167 = vector.shape_cast %166 : vector<1x4x128xf32> to vector<4x128xf32>
    %168 = vector.shape_cast %167 : vector<4x128xf32> to vector<1x4x128xf32>
    %169 = vector.broadcast %168 : vector<1x4x128xf32> to vector<2x4x128xf32>
    %170 = arith.mulf %169, %153 : vector<2x4x128xf32>
    %171 = vector.extract_strided_slice %8 {offsets = [1, 0, 0], sizes = [1, 4, 128], strides = [1, 1, 1]} : vector<2x4x128xf32> to vector<1x4x128xf32>
    %172 = vector.shape_cast %171 : vector<1x4x128xf32> to vector<4x128xf32>
    %173 = vector.shape_cast %172 : vector<4x128xf32> to vector<1x4x128xf32>
    %174 = vector.broadcast %173 : vector<1x4x128xf32> to vector<2x4x128xf32>
    %175 = arith.mulf %174, %165 : vector<2x4x128xf32>
    %176 = arith.subf %170, %175 : vector<2x4x128xf32>
    %cst_38 = arith.constant dense<0.000000e+00> : vector<2x128xf32>
    %177 = vector.multi_reduction <add>, %176, %cst_38 [1] : vector<2x4x128xf32> to vector<2x128xf32>
    %178 = arith.addf %140, %177 : vector<2x128xf32>
    %179 = arith.index_cast %c1_i32 : i32 to index
    %c0_39 = arith.constant 0 : index
    %c0_40 = arith.constant 0 : index
    %180 = vector.load %arg9[%179, %c0_39, %c0_40] : memref<8x2x128xf32, #tpu.memory_space<vmem>>, vector<1x2x128xf32>
    %181 = vector.shape_cast %180 : vector<1x2x128xf32> to vector<2x128xf32>
    %182 = vector.shape_cast %178 : vector<2x128xf32> to vector<1x2x128xf32>
    tpu.vector_store %arg9[%179, %c0_39, %c0_40], %182 {strides = array<i32>} : memref<8x2x128xf32, #tpu.memory_space<vmem>>, vector<1x2x128xf32>,
    %c2_i32 = arith.constant 2 : i32
    %183 = arith.index_cast %c2_i32 : i32 to index
    %c0_41 = arith.constant 0 : index
    %c0_42 = arith.constant 0 : index
    %184 = vector.load %arg2[%183, %c0_41, %c0_42] : memref<8x2x128xf32, #tpu.memory_space<vmem>>, vector<1x2x128xf32>
    %185 = vector.shape_cast %184 : vector<1x2x128xf32> to vector<2x128xf32>
    %186 = vector.shape_cast %185 : vector<2x128xf32> to vector<2x1x128xf32>
    %187 = vector.shape_cast %3 : vector<4x128xf32> to vector<1x4x128xf32>
    %188 = vector.broadcast %187 : vector<1x4x128xf32> to vector<2x4x128xf32>
    %189 = arith.mulf %188, %115 : vector<2x4x128xf32>
    %190 = vector.shape_cast %4 : vector<4x128xf32> to vector<1x4x128xf32>
    %191 = vector.broadcast %190 : vector<1x4x128xf32> to vector<2x4x128xf32>
    %192 = arith.mulf %191, %127 : vector<2x4x128xf32>
    %193 = arith.subf %189, %192 : vector<2x4x128xf32>
    %194 = vector.shape_cast %5 : vector<4x128xf32> to vector<1x4x128xf32>
    %195 = vector.broadcast %186 : vector<2x1x128xf32> to vector<2x4x128xf32>
    %196 = vector.broadcast %194 : vector<1x4x128xf32> to vector<2x4x128xf32>
    %197 = arith.mulf %195, %196 : vector<2x4x128xf32>
    %198 = arith.addf %193, %197 : vector<2x4x128xf32>
    %199 = vector.shape_cast %3 : vector<4x128xf32> to vector<1x4x128xf32>
    %200 = vector.broadcast %199 : vector<1x4x128xf32> to vector<2x4x128xf32>
    %201 = arith.mulf %200, %127 : vector<2x4x128xf32>
    %202 = vector.shape_cast %4 : vector<4x128xf32> to vector<1x4x128xf32>
    %203 = vector.broadcast %202 : vector<1x4x128xf32> to vector<2x4x128xf32>
    %204 = arith.mulf %203, %115 : vector<2x4x128xf32>
    %205 = arith.addf %201, %204 : vector<2x4x128xf32>
    %206 = vector.shape_cast %6 : vector<4x128xf32> to vector<1x4x128xf32>
    %207 = vector.broadcast %186 : vector<2x1x128xf32> to vector<2x4x128xf32>
    %208 = vector.broadcast %206 : vector<1x4x128xf32> to vector<2x4x128xf32>
    %209 = arith.mulf %207, %208 : vector<2x4x128xf32>
    %210 = arith.addf %205, %209 : vector<2x4x128xf32>
    %211 = vector.extract_strided_slice %7 {offsets = [0, 0, 0], sizes = [1, 4, 128], strides = [1, 1, 1]} : vector<2x4x128xf32> to vector<1x4x128xf32>
    %212 = vector.shape_cast %211 : vector<1x4x128xf32> to vector<4x128xf32>
    %213 = vector.shape_cast %212 : vector<4x128xf32> to vector<1x4x128xf32>
    %214 = vector.broadcast %213 : vector<1x4x128xf32> to vector<2x4x128xf32>
    %215 = arith.mulf %214, %198 : vector<2x4x128xf32>
    %216 = vector.extract_strided_slice %8 {offsets = [0, 0, 0], sizes = [1, 4, 128], strides = [1, 1, 1]} : vector<2x4x128xf32> to vector<1x4x128xf32>
    %217 = vector.shape_cast %216 : vector<1x4x128xf32> to vector<4x128xf32>
    %218 = vector.shape_cast %217 : vector<4x128xf32> to vector<1x4x128xf32>
    %219 = vector.broadcast %218 : vector<1x4x128xf32> to vector<2x4x128xf32>
    %220 = arith.mulf %219, %210 : vector<2x4x128xf32>
    %221 = arith.subf %215, %220 : vector<2x4x128xf32>
    %cst_43 = arith.constant dense<0.000000e+00> : vector<2x128xf32>
    %222 = vector.multi_reduction <add>, %221, %cst_43 [1] : vector<2x4x128xf32> to vector<2x128xf32>
    %223 = arith.addf %185, %222 : vector<2x128xf32>
    %224 = vector.shape_cast %223 : vector<2x128xf32> to vector<2x1x128xf32>
    %225 = vector.shape_cast %3 : vector<4x128xf32> to vector<1x4x128xf32>
    %226 = vector.broadcast %225 : vector<1x4x128xf32> to vector<2x4x128xf32>
    %227 = arith.mulf %226, %153 : vector<2x4x128xf32>
    %228 = vector.shape_cast %4 : vector<4x128xf32> to vector<1x4x128xf32>
    %229 = vector.broadcast %228 : vector<1x4x128xf32> to vector<2x4x128xf32>
    %230 = arith.mulf %229, %165 : vector<2x4x128xf32>
    %231 = arith.subf %227, %230 : vector<2x4x128xf32>
    %232 = vector.shape_cast %5 : vector<4x128xf32> to vector<1x4x128xf32>
    %233 = vector.broadcast %224 : vector<2x1x128xf32> to vector<2x4x128xf32>
    %234 = vector.broadcast %232 : vector<1x4x128xf32> to vector<2x4x128xf32>
    %235 = arith.mulf %233, %234 : vector<2x4x128xf32>
    %236 = arith.addf %231, %235 : vector<2x4x128xf32>
    %237 = vector.shape_cast %3 : vector<4x128xf32> to vector<1x4x128xf32>
    %238 = vector.broadcast %237 : vector<1x4x128xf32> to vector<2x4x128xf32>
    %239 = arith.mulf %238, %165 : vector<2x4x128xf32>
    %240 = vector.shape_cast %4 : vector<4x128xf32> to vector<1x4x128xf32>
    %241 = vector.broadcast %240 : vector<1x4x128xf32> to vector<2x4x128xf32>
    %242 = arith.mulf %241, %153 : vector<2x4x128xf32>
    %243 = arith.addf %239, %242 : vector<2x4x128xf32>
    %244 = vector.shape_cast %6 : vector<4x128xf32> to vector<1x4x128xf32>
    %245 = vector.broadcast %224 : vector<2x1x128xf32> to vector<2x4x128xf32>
    %246 = vector.broadcast %244 : vector<1x4x128xf32> to vector<2x4x128xf32>
    %247 = arith.mulf %245, %246 : vector<2x4x128xf32>
    %248 = arith.addf %243, %247 : vector<2x4x128xf32>
    %249 = vector.extract_strided_slice %7 {offsets = [1, 0, 0], sizes = [1, 4, 128], strides = [1, 1, 1]} : vector<2x4x128xf32> to vector<1x4x128xf32>
    %250 = vector.shape_cast %249 : vector<1x4x128xf32> to vector<4x128xf32>
    %251 = vector.shape_cast %250 : vector<4x128xf32> to vector<1x4x128xf32>
    %252 = vector.broadcast %251 : vector<1x4x128xf32> to vector<2x4x128xf32>
    %253 = arith.mulf %252, %236 : vector<2x4x128xf32>
    %254 = vector.extract_strided_slice %8 {offsets = [1, 0, 0], sizes = [1, 4, 128], strides = [1, 1, 1]} : vector<2x4x128xf32> to vector<1x4x128xf32>
    %255 = vector.shape_cast %254 : vector<1x4x128xf32> to vector<4x128xf32>
    %256 = vector.shape_cast %255 : vector<4x128xf32> to vector<1x4x128xf32>
    %257 = vector.broadcast %256 : vector<1x4x128xf32> to vector<2x4x128xf32>
    %258 = arith.mulf %257, %248 : vector<2x4x128xf32>
    %259 = arith.subf %253, %258 : vector<2x4x128xf32>
    %cst_44 = arith.constant dense<0.000000e+00> : vector<2x128xf32>
    %260 = vector.multi_reduction <add>, %259, %cst_44 [1] : vector<2x4x128xf32> to vector<2x128xf32>
    %261 = arith.addf %223, %260 : vector<2x128xf32>
    %262 = arith.index_cast %c2_i32 : i32 to index
    %c0_45 = arith.constant 0 : index
    %c0_46 = arith.constant 0 : index
    %263 = vector.load %arg9[%262, %c0_45, %c0_46] : memref<8x2x128xf32, #tpu.memory_space<vmem>>, vector<1x2x128xf32>
    %264 = vector.shape_cast %263 : vector<1x2x128xf32> to vector<2x128xf32>
    %265 = vector.shape_cast %261 : vector<2x128xf32> to vector<1x2x128xf32>
    tpu.vector_store %arg9[%262, %c0_45, %c0_46], %265 {strides = array<i32>} : memref<8x2x128xf32, #tpu.memory_space<vmem>>, vector<1x2x128xf32>,
    %c3_i32 = arith.constant 3 : i32
    %266 = arith.index_cast %c3_i32 : i32 to index
    %c0_47 = arith.constant 0 : index
    %c0_48 = arith.constant 0 : index
    %267 = vector.load %arg2[%266, %c0_47, %c0_48] : memref<8x2x128xf32, #tpu.memory_space<vmem>>, vector<1x2x128xf32>
    %268 = vector.shape_cast %267 : vector<1x2x128xf32> to vector<2x128xf32>
    %269 = vector.shape_cast %268 : vector<2x128xf32> to vector<2x1x128xf32>
    %270 = vector.shape_cast %3 : vector<4x128xf32> to vector<1x4x128xf32>
    %271 = vector.broadcast %270 : vector<1x4x128xf32> to vector<2x4x128xf32>
    %272 = arith.mulf %271, %198 : vector<2x4x128xf32>
    %273 = vector.shape_cast %4 : vector<4x128xf32> to vector<1x4x128xf32>
    %274 = vector.broadcast %273 : vector<1x4x128xf32> to vector<2x4x128xf32>
    %275 = arith.mulf %274, %210 : vector<2x4x128xf32>
    %276 = arith.subf %272, %275 : vector<2x4x128xf32>
    %277 = vector.shape_cast %5 : vector<4x128xf32> to vector<1x4x128xf32>
    %278 = vector.broadcast %269 : vector<2x1x128xf32> to vector<2x4x128xf32>
    %279 = vector.broadcast %277 : vector<1x4x128xf32> to vector<2x4x128xf32>
    %280 = arith.mulf %278, %279 : vector<2x4x128xf32>
    %281 = arith.addf %276, %280 : vector<2x4x128xf32>
    %282 = vector.shape_cast %3 : vector<4x128xf32> to vector<1x4x128xf32>
    %283 = vector.broadcast %282 : vector<1x4x128xf32> to vector<2x4x128xf32>
    %284 = arith.mulf %283, %210 : vector<2x4x128xf32>
    %285 = vector.shape_cast %4 : vector<4x128xf32> to vector<1x4x128xf32>
    %286 = vector.broadcast %285 : vector<1x4x128xf32> to vector<2x4x128xf32>
    %287 = arith.mulf %286, %198 : vector<2x4x128xf32>
    %288 = arith.addf %284, %287 : vector<2x4x128xf32>
    %289 = vector.shape_cast %6 : vector<4x128xf32> to vector<1x4x128xf32>
    %290 = vector.broadcast %269 : vector<2x1x128xf32> to vector<2x4x128xf32>
    %291 = vector.broadcast %289 : vector<1x4x128xf32> to vector<2x4x128xf32>
    %292 = arith.mulf %290, %291 : vector<2x4x128xf32>
    %293 = arith.addf %288, %292 : vector<2x4x128xf32>
    %294 = vector.extract_strided_slice %7 {offsets = [0, 0, 0], sizes = [1, 4, 128], strides = [1, 1, 1]} : vector<2x4x128xf32> to vector<1x4x128xf32>
    %295 = vector.shape_cast %294 : vector<1x4x128xf32> to vector<4x128xf32>
    %296 = vector.shape_cast %295 : vector<4x128xf32> to vector<1x4x128xf32>
    %297 = vector.broadcast %296 : vector<1x4x128xf32> to vector<2x4x128xf32>
    %298 = arith.mulf %297, %281 : vector<2x4x128xf32>
    %299 = vector.extract_strided_slice %8 {offsets = [0, 0, 0], sizes = [1, 4, 128], strides = [1, 1, 1]} : vector<2x4x128xf32> to vector<1x4x128xf32>
    %300 = vector.shape_cast %299 : vector<1x4x128xf32> to vector<4x128xf32>
    %301 = vector.shape_cast %300 : vector<4x128xf32> to vector<1x4x128xf32>
    %302 = vector.broadcast %301 : vector<1x4x128xf32> to vector<2x4x128xf32>
    %303 = arith.mulf %302, %293 : vector<2x4x128xf32>
    %304 = arith.subf %298, %303 : vector<2x4x128xf32>
    %cst_49 = arith.constant dense<0.000000e+00> : vector<2x128xf32>
    %305 = vector.multi_reduction <add>, %304, %cst_49 [1] : vector<2x4x128xf32> to vector<2x128xf32>
    %306 = arith.addf %268, %305 : vector<2x128xf32>
    %307 = vector.shape_cast %306 : vector<2x128xf32> to vector<2x1x128xf32>
    %308 = vector.shape_cast %3 : vector<4x128xf32> to vector<1x4x128xf32>
    %309 = vector.broadcast %308 : vector<1x4x128xf32> to vector<2x4x128xf32>
    %310 = arith.mulf %309, %236 : vector<2x4x128xf32>
    %311 = vector.shape_cast %4 : vector<4x128xf32> to vector<1x4x128xf32>
    %312 = vector.broadcast %311 : vector<1x4x128xf32> to vector<2x4x128xf32>
    %313 = arith.mulf %312, %248 : vector<2x4x128xf32>
    %314 = arith.subf %310, %313 : vector<2x4x128xf32>
    %315 = vector.shape_cast %5 : vector<4x128xf32> to vector<1x4x128xf32>
    %316 = vector.broadcast %307 : vector<2x1x128xf32> to vector<2x4x128xf32>
    %317 = vector.broadcast %315 : vector<1x4x128xf32> to vector<2x4x128xf32>
    %318 = arith.mulf %316, %317 : vector<2x4x128xf32>
    %319 = arith.addf %314, %318 : vector<2x4x128xf32>
    %320 = vector.shape_cast %3 : vector<4x128xf32> to vector<1x4x128xf32>
    %321 = vector.broadcast %320 : vector<1x4x128xf32> to vector<2x4x128xf32>
    %322 = arith.mulf %321, %248 : vector<2x4x128xf32>
    %323 = vector.shape_cast %4 : vector<4x128xf32> to vector<1x4x128xf32>
    %324 = vector.broadcast %323 : vector<1x4x128xf32> to vector<2x4x128xf32>
    %325 = arith.mulf %324, %236 : vector<2x4x128xf32>
    %326 = arith.addf %322, %325 : vector<2x4x128xf32>
    %327 = vector.shape_cast %6 : vector<4x128xf32> to vector<1x4x128xf32>
    %328 = vector.broadcast %307 : vector<2x1x128xf32> to vector<2x4x128xf32>
    %329 = vector.broadcast %327 : vector<1x4x128xf32> to vector<2x4x128xf32>
    %330 = arith.mulf %328, %329 : vector<2x4x128xf32>
    %331 = arith.addf %326, %330 : vector<2x4x128xf32>
    %332 = vector.extract_strided_slice %7 {offsets = [1, 0, 0], sizes = [1, 4, 128], strides = [1, 1, 1]} : vector<2x4x128xf32> to vector<1x4x128xf32>
    %333 = vector.shape_cast %332 : vector<1x4x128xf32> to vector<4x128xf32>
    %334 = vector.shape_cast %333 : vector<4x128xf32> to vector<1x4x128xf32>
    %335 = vector.broadcast %334 : vector<1x4x128xf32> to vector<2x4x128xf32>
    %336 = arith.mulf %335, %319 : vector<2x4x128xf32>
    %337 = vector.extract_strided_slice %8 {offsets = [1, 0, 0], sizes = [1, 4, 128], strides = [1, 1, 1]} : vector<2x4x128xf32> to vector<1x4x128xf32>
    %338 = vector.shape_cast %337 : vector<1x4x128xf32> to vector<4x128xf32>
    %339 = vector.shape_cast %338 : vector<4x128xf32> to vector<1x4x128xf32>
    %340 = vector.broadcast %339 : vector<1x4x128xf32> to vector<2x4x128xf32>
    %341 = arith.mulf %340, %331 : vector<2x4x128xf32>
    %342 = arith.subf %336, %341 : vector<2x4x128xf32>
    %cst_50 = arith.constant dense<0.000000e+00> : vector<2x128xf32>
    %343 = vector.multi_reduction <add>, %342, %cst_50 [1] : vector<2x4x128xf32> to vector<2x128xf32>
    %344 = arith.addf %306, %343 : vector<2x128xf32>
    %345 = arith.index_cast %c3_i32 : i32 to index
    %c0_51 = arith.constant 0 : index
    %c0_52 = arith.constant 0 : index
    %346 = vector.load %arg9[%345, %c0_51, %c0_52] : memref<8x2x128xf32, #tpu.memory_space<vmem>>, vector<1x2x128xf32>
    %347 = vector.shape_cast %346 : vector<1x2x128xf32> to vector<2x128xf32>
    %348 = vector.shape_cast %344 : vector<2x128xf32> to vector<1x2x128xf32>
    tpu.vector_store %arg9[%345, %c0_51, %c0_52], %348 {strides = array<i32>} : memref<8x2x128xf32, #tpu.memory_space<vmem>>, vector<1x2x128xf32>,
    %c4_i32 = arith.constant 4 : i32
    %349 = arith.index_cast %c4_i32 : i32 to index
    %c0_53 = arith.constant 0 : index
    %c0_54 = arith.constant 0 : index
    %350 = vector.load %arg2[%349, %c0_53, %c0_54] : memref<8x2x128xf32, #tpu.memory_space<vmem>>, vector<1x2x128xf32>
    %351 = vector.shape_cast %350 : vector<1x2x128xf32> to vector<2x128xf32>
    %352 = vector.shape_cast %351 : vector<2x128xf32> to vector<2x1x128xf32>
    %353 = vector.shape_cast %3 : vector<4x128xf32> to vector<1x4x128xf32>
    %354 = vector.broadcast %353 : vector<1x4x128xf32> to vector<2x4x128xf32>
    %355 = arith.mulf %354, %281 : vector<2x4x128xf32>
    %356 = vector.shape_cast %4 : vector<4x128xf32> to vector<1x4x128xf32>
    %357 = vector.broadcast %356 : vector<1x4x128xf32> to vector<2x4x128xf32>
    %358 = arith.mulf %357, %293 : vector<2x4x128xf32>
    %359 = arith.subf %355, %358 : vector<2x4x128xf32>
    %360 = vector.shape_cast %5 : vector<4x128xf32> to vector<1x4x128xf32>
    %361 = vector.broadcast %352 : vector<2x1x128xf32> to vector<2x4x128xf32>
    %362 = vector.broadcast %360 : vector<1x4x128xf32> to vector<2x4x128xf32>
    %363 = arith.mulf %361, %362 : vector<2x4x128xf32>
    %364 = arith.addf %359, %363 : vector<2x4x128xf32>
    %365 = vector.shape_cast %3 : vector<4x128xf32> to vector<1x4x128xf32>
    %366 = vector.broadcast %365 : vector<1x4x128xf32> to vector<2x4x128xf32>
    %367 = arith.mulf %366, %293 : vector<2x4x128xf32>
    %368 = vector.shape_cast %4 : vector<4x128xf32> to vector<1x4x128xf32>
    %369 = vector.broadcast %368 : vector<1x4x128xf32> to vector<2x4x128xf32>
    %370 = arith.mulf %369, %281 : vector<2x4x128xf32>
    %371 = arith.addf %367, %370 : vector<2x4x128xf32>
    %372 = vector.shape_cast %6 : vector<4x128xf32> to vector<1x4x128xf32>
    %373 = vector.broadcast %352 : vector<2x1x128xf32> to vector<2x4x128xf32>
    %374 = vector.broadcast %372 : vector<1x4x128xf32> to vector<2x4x128xf32>
    %375 = arith.mulf %373, %374 : vector<2x4x128xf32>
    %376 = arith.addf %371, %375 : vector<2x4x128xf32>
    %377 = vector.extract_strided_slice %7 {offsets = [0, 0, 0], sizes = [1, 4, 128], strides = [1, 1, 1]} : vector<2x4x128xf32> to vector<1x4x128xf32>
    %378 = vector.shape_cast %377 : vector<1x4x128xf32> to vector<4x128xf32>
    %379 = vector.shape_cast %378 : vector<4x128xf32> to vector<1x4x128xf32>
    %380 = vector.broadcast %379 : vector<1x4x128xf32> to vector<2x4x128xf32>
    %381 = arith.mulf %380, %364 : vector<2x4x128xf32>
    %382 = vector.extract_strided_slice %8 {offsets = [0, 0, 0], sizes = [1, 4, 128], strides = [1, 1, 1]} : vector<2x4x128xf32> to vector<1x4x128xf32>
    %383 = vector.shape_cast %382 : vector<1x4x128xf32> to vector<4x128xf32>
    %384 = vector.shape_cast %383 : vector<4x128xf32> to vector<1x4x128xf32>
    %385 = vector.broadcast %384 : vector<1x4x128xf32> to vector<2x4x128xf32>
    %386 = arith.mulf %385, %376 : vector<2x4x128xf32>
    %387 = arith.subf %381, %386 : vector<2x4x128xf32>
    %cst_55 = arith.constant dense<0.000000e+00> : vector<2x128xf32>
    %388 = vector.multi_reduction <add>, %387, %cst_55 [1] : vector<2x4x128xf32> to vector<2x128xf32>
    %389 = arith.addf %351, %388 : vector<2x128xf32>
    %390 = vector.shape_cast %389 : vector<2x128xf32> to vector<2x1x128xf32>
    %391 = vector.shape_cast %3 : vector<4x128xf32> to vector<1x4x128xf32>
    %392 = vector.broadcast %391 : vector<1x4x128xf32> to vector<2x4x128xf32>
    %393 = arith.mulf %392, %319 : vector<2x4x128xf32>
    %394 = vector.shape_cast %4 : vector<4x128xf32> to vector<1x4x128xf32>
    %395 = vector.broadcast %394 : vector<1x4x128xf32> to vector<2x4x128xf32>
    %396 = arith.mulf %395, %331 : vector<2x4x128xf32>
    %397 = arith.subf %393, %396 : vector<2x4x128xf32>
    %398 = vector.shape_cast %5 : vector<4x128xf32> to vector<1x4x128xf32>
    %399 = vector.broadcast %390 : vector<2x1x128xf32> to vector<2x4x128xf32>
    %400 = vector.broadcast %398 : vector<1x4x128xf32> to vector<2x4x128xf32>
    %401 = arith.mulf %399, %400 : vector<2x4x128xf32>
    %402 = arith.addf %397, %401 : vector<2x4x128xf32>
    %403 = vector.shape_cast %3 : vector<4x128xf32> to vector<1x4x128xf32>
    %404 = vector.broadcast %403 : vector<1x4x128xf32> to vector<2x4x128xf32>
    %405 = arith.mulf %404, %331 : vector<2x4x128xf32>
    %406 = vector.shape_cast %4 : vector<4x128xf32> to vector<1x4x128xf32>
    %407 = vector.broadcast %406 : vector<1x4x128xf32> to vector<2x4x128xf32>
    %408 = arith.mulf %407, %319 : vector<2x4x128xf32>
    %409 = arith.addf %405, %408 : vector<2x4x128xf32>
    %410 = vector.shape_cast %6 : vector<4x128xf32> to vector<1x4x128xf32>
    %411 = vector.broadcast %390 : vector<2x1x128xf32> to vector<2x4x128xf32>
    %412 = vector.broadcast %410 : vector<1x4x128xf32> to vector<2x4x128xf32>
    %413 = arith.mulf %411, %412 : vector<2x4x128xf32>
    %414 = arith.addf %409, %413 : vector<2x4x128xf32>
    %415 = vector.extract_strided_slice %7 {offsets = [1, 0, 0], sizes = [1, 4, 128], strides = [1, 1, 1]} : vector<2x4x128xf32> to vector<1x4x128xf32>
    %416 = vector.shape_cast %415 : vector<1x4x128xf32> to vector<4x128xf32>
    %417 = vector.shape_cast %416 : vector<4x128xf32> to vector<1x4x128xf32>
    %418 = vector.broadcast %417 : vector<1x4x128xf32> to vector<2x4x128xf32>
    %419 = arith.mulf %418, %402 : vector<2x4x128xf32>
    %420 = vector.extract_strided_slice %8 {offsets = [1, 0, 0], sizes = [1, 4, 128], strides = [1, 1, 1]} : vector<2x4x128xf32> to vector<1x4x128xf32>
    %421 = vector.shape_cast %420 : vector<1x4x128xf32> to vector<4x128xf32>
    %422 = vector.shape_cast %421 : vector<4x128xf32> to vector<1x4x128xf32>
    %423 = vector.broadcast %422 : vector<1x4x128xf32> to vector<2x4x128xf32>
    %424 = arith.mulf %423, %414 : vector<2x4x128xf32>
    %425 = arith.subf %419, %424 : vector<2x4x128xf32>
    %cst_56 = arith.constant dense<0.000000e+00> : vector<2x128xf32>
    %426 = vector.multi_reduction <add>, %425, %cst_56 [1] : vector<2x4x128xf32> to vector<2x128xf32>
    %427 = arith.addf %389, %426 : vector<2x128xf32>
    %428 = arith.index_cast %c4_i32 : i32 to index
    %c0_57 = arith.constant 0 : index
    %c0_58 = arith.constant 0 : index
    %429 = vector.load %arg9[%428, %c0_57, %c0_58] : memref<8x2x128xf32, #tpu.memory_space<vmem>>, vector<1x2x128xf32>
    %430 = vector.shape_cast %429 : vector<1x2x128xf32> to vector<2x128xf32>
    %431 = vector.shape_cast %427 : vector<2x128xf32> to vector<1x2x128xf32>
    tpu.vector_store %arg9[%428, %c0_57, %c0_58], %431 {strides = array<i32>} : memref<8x2x128xf32, #tpu.memory_space<vmem>>, vector<1x2x128xf32>,
    %c5_i32 = arith.constant 5 : i32
    %432 = arith.index_cast %c5_i32 : i32 to index
    %c0_59 = arith.constant 0 : index
    %c0_60 = arith.constant 0 : index
    %433 = vector.load %arg2[%432, %c0_59, %c0_60] : memref<8x2x128xf32, #tpu.memory_space<vmem>>, vector<1x2x128xf32>
    %434 = vector.shape_cast %433 : vector<1x2x128xf32> to vector<2x128xf32>
    %435 = vector.shape_cast %434 : vector<2x128xf32> to vector<2x1x128xf32>
    %436 = vector.shape_cast %3 : vector<4x128xf32> to vector<1x4x128xf32>
    %437 = vector.broadcast %436 : vector<1x4x128xf32> to vector<2x4x128xf32>
    %438 = arith.mulf %437, %364 : vector<2x4x128xf32>
    %439 = vector.shape_cast %4 : vector<4x128xf32> to vector<1x4x128xf32>
    %440 = vector.broadcast %439 : vector<1x4x128xf32> to vector<2x4x128xf32>
    %441 = arith.mulf %440, %376 : vector<2x4x128xf32>
    %442 = arith.subf %438, %441 : vector<2x4x128xf32>
    %443 = vector.shape_cast %5 : vector<4x128xf32> to vector<1x4x128xf32>
    %444 = vector.broadcast %435 : vector<2x1x128xf32> to vector<2x4x128xf32>
    %445 = vector.broadcast %443 : vector<1x4x128xf32> to vector<2x4x128xf32>
    %446 = arith.mulf %444, %445 : vector<2x4x128xf32>
    %447 = arith.addf %442, %446 : vector<2x4x128xf32>
    %448 = vector.shape_cast %3 : vector<4x128xf32> to vector<1x4x128xf32>
    %449 = vector.broadcast %448 : vector<1x4x128xf32> to vector<2x4x128xf32>
    %450 = arith.mulf %449, %376 : vector<2x4x128xf32>
    %451 = vector.shape_cast %4 : vector<4x128xf32> to vector<1x4x128xf32>
    %452 = vector.broadcast %451 : vector<1x4x128xf32> to vector<2x4x128xf32>
    %453 = arith.mulf %452, %364 : vector<2x4x128xf32>
    %454 = arith.addf %450, %453 : vector<2x4x128xf32>
    %455 = vector.shape_cast %6 : vector<4x128xf32> to vector<1x4x128xf32>
    %456 = vector.broadcast %435 : vector<2x1x128xf32> to vector<2x4x128xf32>
    %457 = vector.broadcast %455 : vector<1x4x128xf32> to vector<2x4x128xf32>
    %458 = arith.mulf %456, %457 : vector<2x4x128xf32>
    %459 = arith.addf %454, %458 : vector<2x4x128xf32>
    %460 = vector.extract_strided_slice %7 {offsets = [0, 0, 0], sizes = [1, 4, 128], strides = [1, 1, 1]} : vector<2x4x128xf32> to vector<1x4x128xf32>
    %461 = vector.shape_cast %460 : vector<1x4x128xf32> to vector<4x128xf32>
    %462 = vector.shape_cast %461 : vector<4x128xf32> to vector<1x4x128xf32>
    %463 = vector.broadcast %462 : vector<1x4x128xf32> to vector<2x4x128xf32>
    %464 = arith.mulf %463, %447 : vector<2x4x128xf32>
    %465 = vector.extract_strided_slice %8 {offsets = [0, 0, 0], sizes = [1, 4, 128], strides = [1, 1, 1]} : vector<2x4x128xf32> to vector<1x4x128xf32>
    %466 = vector.shape_cast %465 : vector<1x4x128xf32> to vector<4x128xf32>
    %467 = vector.shape_cast %466 : vector<4x128xf32> to vector<1x4x128xf32>
    %468 = vector.broadcast %467 : vector<1x4x128xf32> to vector<2x4x128xf32>
    %469 = arith.mulf %468, %459 : vector<2x4x128xf32>
    %470 = arith.subf %464, %469 : vector<2x4x128xf32>
    %cst_61 = arith.constant dense<0.000000e+00> : vector<2x128xf32>
    %471 = vector.multi_reduction <add>, %470, %cst_61 [1] : vector<2x4x128xf32> to vector<2x128xf32>
    %472 = arith.addf %434, %471 : vector<2x128xf32>
    %473 = vector.shape_cast %472 : vector<2x128xf32> to vector<2x1x128xf32>
    %474 = vector.shape_cast %3 : vector<4x128xf32> to vector<1x4x128xf32>
    %475 = vector.broadcast %474 : vector<1x4x128xf32> to vector<2x4x128xf32>
    %476 = arith.mulf %475, %402 : vector<2x4x128xf32>
    %477 = vector.shape_cast %4 : vector<4x128xf32> to vector<1x4x128xf32>
    %478 = vector.broadcast %477 : vector<1x4x128xf32> to vector<2x4x128xf32>
    %479 = arith.mulf %478, %414 : vector<2x4x128xf32>
    %480 = arith.subf %476, %479 : vector<2x4x128xf32>
    %481 = vector.shape_cast %5 : vector<4x128xf32> to vector<1x4x128xf32>
    %482 = vector.broadcast %473 : vector<2x1x128xf32> to vector<2x4x128xf32>
    %483 = vector.broadcast %481 : vector<1x4x128xf32> to vector<2x4x128xf32>
    %484 = arith.mulf %482, %483 : vector<2x4x128xf32>
    %485 = arith.addf %480, %484 : vector<2x4x128xf32>
    %486 = vector.shape_cast %3 : vector<4x128xf32> to vector<1x4x128xf32>
    %487 = vector.broadcast %486 : vector<1x4x128xf32> to vector<2x4x128xf32>
    %488 = arith.mulf %487, %414 : vector<2x4x128xf32>
    %489 = vector.shape_cast %4 : vector<4x128xf32> to vector<1x4x128xf32>
    %490 = vector.broadcast %489 : vector<1x4x128xf32> to vector<2x4x128xf32>
    %491 = arith.mulf %490, %402 : vector<2x4x128xf32>
    %492 = arith.addf %488, %491 : vector<2x4x128xf32>
    %493 = vector.shape_cast %6 : vector<4x128xf32> to vector<1x4x128xf32>
    %494 = vector.broadcast %473 : vector<2x1x128xf32> to vector<2x4x128xf32>
    %495 = vector.broadcast %493 : vector<1x4x128xf32> to vector<2x4x128xf32>
    %496 = arith.mulf %494, %495 : vector<2x4x128xf32>
    %497 = arith.addf %492, %496 : vector<2x4x128xf32>
    %498 = vector.extract_strided_slice %7 {offsets = [1, 0, 0], sizes = [1, 4, 128], strides = [1, 1, 1]} : vector<2x4x128xf32> to vector<1x4x128xf32>
    %499 = vector.shape_cast %498 : vector<1x4x128xf32> to vector<4x128xf32>
    %500 = vector.shape_cast %499 : vector<4x128xf32> to vector<1x4x128xf32>
    %501 = vector.broadcast %500 : vector<1x4x128xf32> to vector<2x4x128xf32>
    %502 = arith.mulf %501, %485 : vector<2x4x128xf32>
    %503 = vector.extract_strided_slice %8 {offsets = [1, 0, 0], sizes = [1, 4, 128], strides = [1, 1, 1]} : vector<2x4x128xf32> to vector<1x4x128xf32>
    %504 = vector.shape_cast %503 : vector<1x4x128xf32> to vector<4x128xf32>
    %505 = vector.shape_cast %504 : vector<4x128xf32> to vector<1x4x128xf32>
    %506 = vector.broadcast %505 : vector<1x4x128xf32> to vector<2x4x128xf32>
    %507 = arith.mulf %506, %497 : vector<2x4x128xf32>
    %508 = arith.subf %502, %507 : vector<2x4x128xf32>
    %cst_62 = arith.constant dense<0.000000e+00> : vector<2x128xf32>
    %509 = vector.multi_reduction <add>, %508, %cst_62 [1] : vector<2x4x128xf32> to vector<2x128xf32>
    %510 = arith.addf %472, %509 : vector<2x128xf32>
    %511 = arith.index_cast %c5_i32 : i32 to index
    %c0_63 = arith.constant 0 : index
    %c0_64 = arith.constant 0 : index
    %512 = vector.load %arg9[%511, %c0_63, %c0_64] : memref<8x2x128xf32, #tpu.memory_space<vmem>>, vector<1x2x128xf32>
    %513 = vector.shape_cast %512 : vector<1x2x128xf32> to vector<2x128xf32>
    %514 = vector.shape_cast %510 : vector<2x128xf32> to vector<1x2x128xf32>
    tpu.vector_store %arg9[%511, %c0_63, %c0_64], %514 {strides = array<i32>} : memref<8x2x128xf32, #tpu.memory_space<vmem>>, vector<1x2x128xf32>,
    %c6_i32 = arith.constant 6 : i32
    %515 = arith.index_cast %c6_i32 : i32 to index
    %c0_65 = arith.constant 0 : index
    %c0_66 = arith.constant 0 : index
    %516 = vector.load %arg2[%515, %c0_65, %c0_66] : memref<8x2x128xf32, #tpu.memory_space<vmem>>, vector<1x2x128xf32>
    %517 = vector.shape_cast %516 : vector<1x2x128xf32> to vector<2x128xf32>
    %518 = vector.shape_cast %517 : vector<2x128xf32> to vector<2x1x128xf32>
    %519 = vector.shape_cast %3 : vector<4x128xf32> to vector<1x4x128xf32>
    %520 = vector.broadcast %519 : vector<1x4x128xf32> to vector<2x4x128xf32>
    %521 = arith.mulf %520, %447 : vector<2x4x128xf32>
    %522 = vector.shape_cast %4 : vector<4x128xf32> to vector<1x4x128xf32>
    %523 = vector.broadcast %522 : vector<1x4x128xf32> to vector<2x4x128xf32>
    %524 = arith.mulf %523, %459 : vector<2x4x128xf32>
    %525 = arith.subf %521, %524 : vector<2x4x128xf32>
    %526 = vector.shape_cast %5 : vector<4x128xf32> to vector<1x4x128xf32>
    %527 = vector.broadcast %518 : vector<2x1x128xf32> to vector<2x4x128xf32>
    %528 = vector.broadcast %526 : vector<1x4x128xf32> to vector<2x4x128xf32>
    %529 = arith.mulf %527, %528 : vector<2x4x128xf32>
    %530 = arith.addf %525, %529 : vector<2x4x128xf32>
    %531 = vector.shape_cast %3 : vector<4x128xf32> to vector<1x4x128xf32>
    %532 = vector.broadcast %531 : vector<1x4x128xf32> to vector<2x4x128xf32>
    %533 = arith.mulf %532, %459 : vector<2x4x128xf32>
    %534 = vector.shape_cast %4 : vector<4x128xf32> to vector<1x4x128xf32>
    %535 = vector.broadcast %534 : vector<1x4x128xf32> to vector<2x4x128xf32>
    %536 = arith.mulf %535, %447 : vector<2x4x128xf32>
    %537 = arith.addf %533, %536 : vector<2x4x128xf32>
    %538 = vector.shape_cast %6 : vector<4x128xf32> to vector<1x4x128xf32>
    %539 = vector.broadcast %518 : vector<2x1x128xf32> to vector<2x4x128xf32>
    %540 = vector.broadcast %538 : vector<1x4x128xf32> to vector<2x4x128xf32>
    %541 = arith.mulf %539, %540 : vector<2x4x128xf32>
    %542 = arith.addf %537, %541 : vector<2x4x128xf32>
    %543 = vector.extract_strided_slice %7 {offsets = [0, 0, 0], sizes = [1, 4, 128], strides = [1, 1, 1]} : vector<2x4x128xf32> to vector<1x4x128xf32>
    %544 = vector.shape_cast %543 : vector<1x4x128xf32> to vector<4x128xf32>
    %545 = vector.shape_cast %544 : vector<4x128xf32> to vector<1x4x128xf32>
    %546 = vector.broadcast %545 : vector<1x4x128xf32> to vector<2x4x128xf32>
    %547 = arith.mulf %546, %530 : vector<2x4x128xf32>
    %548 = vector.extract_strided_slice %8 {offsets = [0, 0, 0], sizes = [1, 4, 128], strides = [1, 1, 1]} : vector<2x4x128xf32> to vector<1x4x128xf32>
    %549 = vector.shape_cast %548 : vector<1x4x128xf32> to vector<4x128xf32>
    %550 = vector.shape_cast %549 : vector<4x128xf32> to vector<1x4x128xf32>
    %551 = vector.broadcast %550 : vector<1x4x128xf32> to vector<2x4x128xf32>
    %552 = arith.mulf %551, %542 : vector<2x4x128xf32>
    %553 = arith.subf %547, %552 : vector<2x4x128xf32>
    %cst_67 = arith.constant dense<0.000000e+00> : vector<2x128xf32>
    %554 = vector.multi_reduction <add>, %553, %cst_67 [1] : vector<2x4x128xf32> to vector<2x128xf32>
    %555 = arith.addf %517, %554 : vector<2x128xf32>
    %556 = vector.shape_cast %555 : vector<2x128xf32> to vector<2x1x128xf32>
    %557 = vector.shape_cast %3 : vector<4x128xf32> to vector<1x4x128xf32>
    %558 = vector.broadcast %557 : vector<1x4x128xf32> to vector<2x4x128xf32>
    %559 = arith.mulf %558, %485 : vector<2x4x128xf32>
    %560 = vector.shape_cast %4 : vector<4x128xf32> to vector<1x4x128xf32>
    %561 = vector.broadcast %560 : vector<1x4x128xf32> to vector<2x4x128xf32>
    %562 = arith.mulf %561, %497 : vector<2x4x128xf32>
    %563 = arith.subf %559, %562 : vector<2x4x128xf32>
    %564 = vector.shape_cast %5 : vector<4x128xf32> to vector<1x4x128xf32>
    %565 = vector.broadcast %556 : vector<2x1x128xf32> to vector<2x4x128xf32>
    %566 = vector.broadcast %564 : vector<1x4x128xf32> to vector<2x4x128xf32>
    %567 = arith.mulf %565, %566 : vector<2x4x128xf32>
    %568 = arith.addf %563, %567 : vector<2x4x128xf32>
    %569 = vector.shape_cast %3 : vector<4x128xf32> to vector<1x4x128xf32>
    %570 = vector.broadcast %569 : vector<1x4x128xf32> to vector<2x4x128xf32>
    %571 = arith.mulf %570, %497 : vector<2x4x128xf32>
    %572 = vector.shape_cast %4 : vector<4x128xf32> to vector<1x4x128xf32>
    %573 = vector.broadcast %572 : vector<1x4x128xf32> to vector<2x4x128xf32>
    %574 = arith.mulf %573, %485 : vector<2x4x128xf32>
    %575 = arith.addf %571, %574 : vector<2x4x128xf32>
    %576 = vector.shape_cast %6 : vector<4x128xf32> to vector<1x4x128xf32>
    %577 = vector.broadcast %556 : vector<2x1x128xf32> to vector<2x4x128xf32>
    %578 = vector.broadcast %576 : vector<1x4x128xf32> to vector<2x4x128xf32>
    %579 = arith.mulf %577, %578 : vector<2x4x128xf32>
    %580 = arith.addf %575, %579 : vector<2x4x128xf32>
    %581 = vector.extract_strided_slice %7 {offsets = [1, 0, 0], sizes = [1, 4, 128], strides = [1, 1, 1]} : vector<2x4x128xf32> to vector<1x4x128xf32>
    %582 = vector.shape_cast %581 : vector<1x4x128xf32> to vector<4x128xf32>
    %583 = vector.shape_cast %582 : vector<4x128xf32> to vector<1x4x128xf32>
    %584 = vector.broadcast %583 : vector<1x4x128xf32> to vector<2x4x128xf32>
    %585 = arith.mulf %584, %568 : vector<2x4x128xf32>
    %586 = vector.extract_strided_slice %8 {offsets = [1, 0, 0], sizes = [1, 4, 128], strides = [1, 1, 1]} : vector<2x4x128xf32> to vector<1x4x128xf32>
    %587 = vector.shape_cast %586 : vector<1x4x128xf32> to vector<4x128xf32>
    %588 = vector.shape_cast %587 : vector<4x128xf32> to vector<1x4x128xf32>
    %589 = vector.broadcast %588 : vector<1x4x128xf32> to vector<2x4x128xf32>
    %590 = arith.mulf %589, %580 : vector<2x4x128xf32>
    %591 = arith.subf %585, %590 : vector<2x4x128xf32>
    %cst_68 = arith.constant dense<0.000000e+00> : vector<2x128xf32>
    %592 = vector.multi_reduction <add>, %591, %cst_68 [1] : vector<2x4x128xf32> to vector<2x128xf32>
    %593 = arith.addf %555, %592 : vector<2x128xf32>
    %594 = arith.index_cast %c6_i32 : i32 to index
    %c0_69 = arith.constant 0 : index
    %c0_70 = arith.constant 0 : index
    %595 = vector.load %arg9[%594, %c0_69, %c0_70] : memref<8x2x128xf32, #tpu.memory_space<vmem>>, vector<1x2x128xf32>
    %596 = vector.shape_cast %595 : vector<1x2x128xf32> to vector<2x128xf32>
    %597 = vector.shape_cast %593 : vector<2x128xf32> to vector<1x2x128xf32>
    tpu.vector_store %arg9[%594, %c0_69, %c0_70], %597 {strides = array<i32>} : memref<8x2x128xf32, #tpu.memory_space<vmem>>, vector<1x2x128xf32>,
    %c7_i32 = arith.constant 7 : i32
    %598 = arith.index_cast %c7_i32 : i32 to index
    %c0_71 = arith.constant 0 : index
    %c0_72 = arith.constant 0 : index
    %599 = vector.load %arg2[%598, %c0_71, %c0_72] : memref<8x2x128xf32, #tpu.memory_space<vmem>>, vector<1x2x128xf32>
    %600 = vector.shape_cast %599 : vector<1x2x128xf32> to vector<2x128xf32>
    %601 = vector.shape_cast %600 : vector<2x128xf32> to vector<2x1x128xf32>
    %602 = vector.shape_cast %3 : vector<4x128xf32> to vector<1x4x128xf32>
    %603 = vector.broadcast %602 : vector<1x4x128xf32> to vector<2x4x128xf32>
    %604 = arith.mulf %603, %530 : vector<2x4x128xf32>
    %605 = vector.shape_cast %4 : vector<4x128xf32> to vector<1x4x128xf32>
    %606 = vector.broadcast %605 : vector<1x4x128xf32> to vector<2x4x128xf32>
    %607 = arith.mulf %606, %542 : vector<2x4x128xf32>
    %608 = arith.subf %604, %607 : vector<2x4x128xf32>
    %609 = vector.shape_cast %5 : vector<4x128xf32> to vector<1x4x128xf32>
    %610 = vector.broadcast %601 : vector<2x1x128xf32> to vector<2x4x128xf32>
    %611 = vector.broadcast %609 : vector<1x4x128xf32> to vector<2x4x128xf32>
    %612 = arith.mulf %610, %611 : vector<2x4x128xf32>
    %613 = arith.addf %608, %612 : vector<2x4x128xf32>
    %614 = vector.shape_cast %3 : vector<4x128xf32> to vector<1x4x128xf32>
    %615 = vector.broadcast %614 : vector<1x4x128xf32> to vector<2x4x128xf32>
    %616 = arith.mulf %615, %542 : vector<2x4x128xf32>
    %617 = vector.shape_cast %4 : vector<4x128xf32> to vector<1x4x128xf32>
    %618 = vector.broadcast %617 : vector<1x4x128xf32> to vector<2x4x128xf32>
    %619 = arith.mulf %618, %530 : vector<2x4x128xf32>
    %620 = arith.addf %616, %619 : vector<2x4x128xf32>
    %621 = vector.shape_cast %6 : vector<4x128xf32> to vector<1x4x128xf32>
    %622 = vector.broadcast %601 : vector<2x1x128xf32> to vector<2x4x128xf32>
    %623 = vector.broadcast %621 : vector<1x4x128xf32> to vector<2x4x128xf32>
    %624 = arith.mulf %622, %623 : vector<2x4x128xf32>
    %625 = arith.addf %620, %624 : vector<2x4x128xf32>
    %626 = vector.extract_strided_slice %7 {offsets = [0, 0, 0], sizes = [1, 4, 128], strides = [1, 1, 1]} : vector<2x4x128xf32> to vector<1x4x128xf32>
    %627 = vector.shape_cast %626 : vector<1x4x128xf32> to vector<4x128xf32>
    %628 = vector.shape_cast %627 : vector<4x128xf32> to vector<1x4x128xf32>
    %629 = vector.broadcast %628 : vector<1x4x128xf32> to vector<2x4x128xf32>
    %630 = arith.mulf %629, %613 : vector<2x4x128xf32>
    %631 = vector.extract_strided_slice %8 {offsets = [0, 0, 0], sizes = [1, 4, 128], strides = [1, 1, 1]} : vector<2x4x128xf32> to vector<1x4x128xf32>
    %632 = vector.shape_cast %631 : vector<1x4x128xf32> to vector<4x128xf32>
    %633 = vector.shape_cast %632 : vector<4x128xf32> to vector<1x4x128xf32>
    %634 = vector.broadcast %633 : vector<1x4x128xf32> to vector<2x4x128xf32>
    %635 = arith.mulf %634, %625 : vector<2x4x128xf32>
    %636 = arith.subf %630, %635 : vector<2x4x128xf32>
    %cst_73 = arith.constant dense<0.000000e+00> : vector<2x128xf32>
    %637 = vector.multi_reduction <add>, %636, %cst_73 [1] : vector<2x4x128xf32> to vector<2x128xf32>
    %638 = arith.addf %600, %637 : vector<2x128xf32>
    %639 = vector.shape_cast %638 : vector<2x128xf32> to vector<2x1x128xf32>
    %640 = vector.shape_cast %3 : vector<4x128xf32> to vector<1x4x128xf32>
    %641 = vector.broadcast %640 : vector<1x4x128xf32> to vector<2x4x128xf32>
    %642 = arith.mulf %641, %568 : vector<2x4x128xf32>
    %643 = vector.shape_cast %4 : vector<4x128xf32> to vector<1x4x128xf32>
    %644 = vector.broadcast %643 : vector<1x4x128xf32> to vector<2x4x128xf32>
    %645 = arith.mulf %644, %580 : vector<2x4x128xf32>
    %646 = arith.subf %642, %645 : vector<2x4x128xf32>
    %647 = vector.shape_cast %5 : vector<4x128xf32> to vector<1x4x128xf32>
    %648 = vector.broadcast %639 : vector<2x1x128xf32> to vector<2x4x128xf32>
    %649 = vector.broadcast %647 : vector<1x4x128xf32> to vector<2x4x128xf32>
    %650 = arith.mulf %648, %649 : vector<2x4x128xf32>
    %651 = arith.addf %646, %650 : vector<2x4x128xf32>
    %652 = vector.shape_cast %3 : vector<4x128xf32> to vector<1x4x128xf32>
    %653 = vector.broadcast %652 : vector<1x4x128xf32> to vector<2x4x128xf32>
    %654 = arith.mulf %653, %580 : vector<2x4x128xf32>
    %655 = vector.shape_cast %4 : vector<4x128xf32> to vector<1x4x128xf32>
    %656 = vector.broadcast %655 : vector<1x4x128xf32> to vector<2x4x128xf32>
    %657 = arith.mulf %656, %568 : vector<2x4x128xf32>
    %658 = arith.addf %654, %657 : vector<2x4x128xf32>
    %659 = vector.shape_cast %6 : vector<4x128xf32> to vector<1x4x128xf32>
    %660 = vector.broadcast %639 : vector<2x1x128xf32> to vector<2x4x128xf32>
    %661 = vector.broadcast %659 : vector<1x4x128xf32> to vector<2x4x128xf32>
    %662 = arith.mulf %660, %661 : vector<2x4x128xf32>
    %663 = arith.addf %658, %662 : vector<2x4x128xf32>
    %664 = vector.extract_strided_slice %7 {offsets = [1, 0, 0], sizes = [1, 4, 128], strides = [1, 1, 1]} : vector<2x4x128xf32> to vector<1x4x128xf32>
    %665 = vector.shape_cast %664 : vector<1x4x128xf32> to vector<4x128xf32>
    %666 = vector.shape_cast %665 : vector<4x128xf32> to vector<1x4x128xf32>
    %667 = vector.broadcast %666 : vector<1x4x128xf32> to vector<2x4x128xf32>
    %668 = arith.mulf %667, %651 : vector<2x4x128xf32>
    %669 = vector.extract_strided_slice %8 {offsets = [1, 0, 0], sizes = [1, 4, 128], strides = [1, 1, 1]} : vector<2x4x128xf32> to vector<1x4x128xf32>
    %670 = vector.shape_cast %669 : vector<1x4x128xf32> to vector<4x128xf32>
    %671 = vector.shape_cast %670 : vector<4x128xf32> to vector<1x4x128xf32>
    %672 = vector.broadcast %671 : vector<1x4x128xf32> to vector<2x4x128xf32>
    %673 = arith.mulf %672, %663 : vector<2x4x128xf32>
    %674 = arith.subf %668, %673 : vector<2x4x128xf32>
    %cst_74 = arith.constant dense<0.000000e+00> : vector<2x128xf32>
    %675 = vector.multi_reduction <add>, %674, %cst_74 [1] : vector<2x4x128xf32> to vector<2x128xf32>
    %676 = arith.addf %638, %675 : vector<2x128xf32>
    %677 = arith.index_cast %c7_i32 : i32 to index
    %c0_75 = arith.constant 0 : index
    %c0_76 = arith.constant 0 : index
    %678 = vector.load %arg9[%677, %c0_75, %c0_76] : memref<8x2x128xf32, #tpu.memory_space<vmem>>, vector<1x2x128xf32>
    %679 = vector.shape_cast %678 : vector<1x2x128xf32> to vector<2x128xf32>
    %680 = vector.shape_cast %676 : vector<2x128xf32> to vector<1x2x128xf32>
    tpu.vector_store %arg9[%677, %c0_75, %c0_76], %680 {strides = array<i32>} : memref<8x2x128xf32, #tpu.memory_space<vmem>>, vector<1x2x128xf32>,
    %c8_i32 = arith.constant 8 : i32
    %c0_77 = arith.constant 0 : index
    %c0_78 = arith.constant 0 : index
    %c0_79 = arith.constant 0 : index
    %c0_80 = arith.constant 0 : index
    %681 = vector.load %arg10[%c0_77, %c0_78, %c0_79, %c0_80] : memref<2x2x4x128xf32, #tpu.memory_space<vmem>>, vector<1x2x4x128xf32>
    %682 = vector.shape_cast %681 : vector<1x2x4x128xf32> to vector<2x4x128xf32>
    %683 = vector.shape_cast %613 : vector<2x4x128xf32> to vector<1x2x4x128xf32>
    tpu.vector_store %arg10[%c0_77, %c0_78, %c0_79, %c0_80], %683 {strides = array<i32>} : memref<2x2x4x128xf32, #tpu.memory_space<vmem>>, vector<1x2x4x128xf32>,
    %c0_81 = arith.constant 0 : index
    %c0_82 = arith.constant 0 : index
    %c0_83 = arith.constant 0 : index
    %c0_84 = arith.constant 0 : index
    %684 = vector.load %arg11[%c0_81, %c0_82, %c0_83, %c0_84] : memref<2x2x4x128xf32, #tpu.memory_space<vmem>>, vector<1x2x4x128xf32>
    %685 = vector.shape_cast %684 : vector<1x2x4x128xf32> to vector<2x4x128xf32>
    %686 = vector.shape_cast %625 : vector<2x4x128xf32> to vector<1x2x4x128xf32>
    tpu.vector_store %arg11[%c0_81, %c0_82, %c0_83, %c0_84], %686 {strides = array<i32>} : memref<2x2x4x128xf32, #tpu.memory_space<vmem>>, vector<1x2x4x128xf32>,
    %c1_85 = arith.constant 1 : index
    %c0_86 = arith.constant 0 : index
    %c0_87 = arith.constant 0 : index
    %c0_88 = arith.constant 0 : index
    %687 = vector.load %arg10[%c1_85, %c0_86, %c0_87, %c0_88] : memref<2x2x4x128xf32, #tpu.memory_space<vmem>>, vector<1x2x4x128xf32>
    %688 = vector.shape_cast %687 : vector<1x2x4x128xf32> to vector<2x4x128xf32>
    %689 = vector.shape_cast %651 : vector<2x4x128xf32> to vector<1x2x4x128xf32>
    tpu.vector_store %arg10[%c1_85, %c0_86, %c0_87, %c0_88], %689 {strides = array<i32>} : memref<2x2x4x128xf32, #tpu.memory_space<vmem>>, vector<1x2x4x128xf32>,
    %c1_89 = arith.constant 1 : index
    %c0_90 = arith.constant 0 : index
    %c0_91 = arith.constant 0 : index
    %c0_92 = arith.constant 0 : index
    %690 = vector.load %arg11[%c1_89, %c0_90, %c0_91, %c0_92] : memref<2x2x4x128xf32, #tpu.memory_space<vmem>>, vector<1x2x4x128xf32>
    %691 = vector.shape_cast %690 : vector<1x2x4x128xf32> to vector<2x4x128xf32>
    %692 = vector.shape_cast %663 : vector<2x4x128xf32> to vector<1x2x4x128xf32>
    tpu.vector_store %arg11[%c1_89, %c0_90, %c0_91, %c0_92], %692 {strides = array<i32>} : memref<2x2x4x128xf32, #tpu.memory_space<vmem>>, vector<1x2x4x128xf32>,
    return
  }
  func.func @transform_0(%arg0: i32, %arg1: i32) -> (i32, i32, i32) {
    %c0_i32 = arith.constant 0 : i32
    %c0_i32_0 = arith.constant 0 : i32
    return %arg1, %c0_i32, %arg0 : i32, i32, i32
  }
  func.func @transform_1(%arg0: i32, %arg1: i32) -> (i32, i32) {
    %c0_i32 = arith.constant 0 : i32
    %c0_i32_0 = arith.constant 0 : i32
    return %c0_i32, %arg0 : i32, i32
  }
  func.func @transform_2(%arg0: i32, %arg1: i32) -> (i32, i32) {
    %c0_i32 = arith.constant 0 : i32
    %c0_i32_0 = arith.constant 0 : i32
    return %c0_i32, %arg0 : i32, i32
  }
  func.func @transform_3(%arg0: i32, %arg1: i32) -> (i32, i32) {
    %c0_i32 = arith.constant 0 : i32
    %c0_i32_0 = arith.constant 0 : i32
    return %c0_i32, %arg0 : i32, i32
  }
  func.func @transform_4(%arg0: i32, %arg1: i32) -> (i32, i32) {
    %c0_i32 = arith.constant 0 : i32
    %c0_i32_0 = arith.constant 0 : i32
    return %c0_i32, %arg0 : i32, i32
  }
  func.func @transform_5(%arg0: i32, %arg1: i32) -> (i32, i32, i32) {
    %c0_i32 = arith.constant 0 : i32
    %c0_i32_0 = arith.constant 0 : i32
    %c0_i32_1 = arith.constant 0 : i32
    return %c0_i32, %c0_i32_0, %arg0 : i32, i32, i32
  }
  func.func @transform_6(%arg0: i32, %arg1: i32) -> (i32, i32, i32) {
    %c0_i32 = arith.constant 0 : i32
    %c0_i32_0 = arith.constant 0 : i32
    %c0_i32_1 = arith.constant 0 : i32
    return %c0_i32, %c0_i32_0, %arg0 : i32, i32, i32
  }
  func.func @transform_7(%arg0: i32, %arg1: i32) -> (i32, i32, i32) {
    %c0_i32 = arith.constant 0 : i32
    %c0_i32_0 = arith.constant 0 : i32
    return %arg1, %c0_i32, %arg0 : i32, i32, i32
  }
}

</mosaic_0001>

<bundles_post_ra>
// kernel: tpu_custom_call.1
= control target key start
LH: loop header
LB: loop body
LE: loop exit
PB: predicated region body
PF: predicated region fallthrough
CT: control target
= control target key end

     0   :  { %12 = vsyncpa [#allocation5], 0  ;;  %s2526_s0 = inlined_call_operand.hbm [shape: f32[8,2,128], index: 0, kind: input, shape index: {}]   ;;  %s2527_s1 = inlined_call_operand.hbm [shape: f32[4,128], index: 1, kind: input, shape index: {}]   ;;  %s2528_s2 = inlined_call_operand.hbm [shape: f32[4,128], index: 2, kind: input, shape index: {}]   ;;  %s2529_s3 = inlined_call_operand.hbm [shape: f32[4,128], index: 3, kind: input, shape index: {}]   ;;  %s2530_s4 = inlined_call_operand.hbm [shape: f32[4,128], index: 4, kind: input, shape index: {}]   ;;  %s2531_s5 = inlined_call_operand.hbm [shape: f32[2,4,128], index: 5, kind: input, shape index: {}]   ;;  %s2532_s6 = inlined_call_operand.hbm [shape: f32[2,4,128], index: 6, kind: input, shape index: {}]   ;;  %s2533_s7 = inlined_call_operand.hbm [shape: f32[8,2,128], index: 7, kind: output, shape index: {}]  }
   0x1   :  { %13 = vsyncpa [#allocation8], 0 }
   0x2   :  { %14 = vsyncpa [#allocation11], 0 }
   0x3   :  { %15 = vsyncpa [#allocation14], 0 }
   0x4   :  { %16 = vsyncpa [#allocation6], 0  ;;  %s1666_s24 = smov [#allocation7]   ;;  %s1667_s26 = smov [#allocation10]  }
   0x5   :  { %s35_s25 = sshll.u32 %s1666_s24, 4  ;;  %s55_s27 = sshll.u32 %s1667_s26, 4  ;;  %s36_s25 = int_to_ptr.vmem [resolvable:$true] %s35_s25  ;;  %s56_s27 = int_to_ptr.vmem [resolvable:$true] %s55_s27 }
   0x6   :  { %s1480_s30 = scalar_lea.hbm %s2527_s1, 64 }
   0x7   :  { %p1481_p0 = scmp.ne.s32.totalorder %s2527_s1, %s1480_s30  ;;  %p1484_p1 = scmp.lt.u32.totalorder %s1480_s30, %s2527_s1 }
   0x9   :  { %p1486_p2 = pnand %p1484_p1, %p1481_p0 }
   0xb   :  { %1489 = shalt.err (!%p1486_p2)
}
   0xc   :  { %s1490_s12 = scalar_lea.vmem %s36_s25, 64  ;;  %p1495_p4 = scmp.lt.s32.totalorder %s36_s25, %s36_s25 }
   0xd   :  { %p1491_p3 = scmp.ne.s32.totalorder %s36_s25, %s1490_s12  ;;  %p1496_p5 = scmp.lt.s32.totalorder %s1490_s12, %s1490_s12 }
   0xf   :  { %p1497_p6 = por %p1496_p5, %p1495_p4 }
  0x11   :  { %p1498_p7 = pnand %p1497_p6, %p1491_p3 }
  0x13   :  { %1501 = shalt.err (!%p1498_p7)
}
  0x14   :  { %38 = dma.hbm_to_vmem [thread:$0]  %s2527_s1, 64, %s36_s25, [#allocation8]  }
  0x15   :  { %s1502_s17 = scalar_lea.hbm %s2529_s3, 64 }
  0x16   :  { %p1503_p8 = scmp.ne.s32.totalorder %s2529_s3, %s1502_s17  ;;  %p1506_p9 = scmp.lt.u32.totalorder %s1502_s17, %s2529_s3 }
  0x18   :  { %p1508_p10 = pnand %p1506_p9, %p1503_p8 }
  0x1a   :  { %1511 = shalt.err (!%p1508_p10)
}
  0x1b   :  { %s1512_s22 = scalar_lea.vmem %s56_s27, 64  ;;  %p1517_p12 = scmp.lt.s32.totalorder %s56_s27, %s56_s27 }
  0x1c   :  { %p1513_p11 = scmp.ne.s32.totalorder %s56_s27, %s1512_s22  ;;  %p1518_p13 = scmp.lt.s32.totalorder %s1512_s22, %s1512_s22 }
  0x1e   :  { %p1519_p0 = por %p1518_p13, %p1517_p12 }
  0x20   :  { %p1520_p1 = pnand %p1519_p0, %p1513_p11 }
  0x22   :  { %1523 = shalt.err (!%p1520_p1)
}
  0x23   :  { %58 = dma.hbm_to_vmem [thread:$0]  %s2529_s3, 64, %s56_s27, [#allocation11]  }
  0x24   :  { %s1668_s24 = smov [#allocation13]   ;;  %s1524_s29 = scalar_lea.hbm %s2531_s5, 128 }
  0x25   :  { %s74_s25 = sshll.u32 %s1668_s24, 4  ;;  %p1525_p2 = scmp.ne.s32.totalorder %s2531_s5, %s1524_s29  ;;  %s75_s25 = int_to_ptr.vmem [resolvable:$true] %s74_s25 }
  0x26   :  { %p1528_p3 = scmp.lt.u32.totalorder %s1524_s29, %s2531_s5 }
  0x28   :  { %p1530_p4 = pnand %p1528_p3, %p1525_p2 }
  0x2a   :  { %1533 = shalt.err (!%p1530_p4)
}
  0x2b   :  { %s1534_s11 = scalar_lea.vmem %s75_s25, 128  ;;  %p1539_p6 = scmp.lt.s32.totalorder %s75_s25, %s75_s25 }
  0x2c   :  { %p1535_p5 = scmp.ne.s32.totalorder %s75_s25, %s1534_s11  ;;  %p1540_p7 = scmp.lt.s32.totalorder %s1534_s11, %s1534_s11 }
  0x2e   :  { %p1541_p8 = por %p1540_p7, %p1539_p6 }
  0x30   :  { %p1542_p9 = pnand %p1541_p8, %p1535_p5 }
  0x32   :  { %1545 = shalt.err (!%p1542_p9)
}
  0x33   :  { %s1669_s3 = smov 64   ;;  %s1670_s27 = smov 4  }
  0x34   :  { %80 = dma.hbm_to_vmem [thread:$0]  %s2531_s5, 128, %s75_s25, [#allocation14], %s1669_s3, %s1669_s3, %s1670_s27  }
  0x35   :  { %s1671_s14 = smov [#allocation4]   ;;  %s1546_s18 = scalar_lea.hbm %s2526_s0, 256 }
  0x36   :  { %s22_s15 = sshll.u32 %s1671_s14, 4  ;;  %p1547_p10 = scmp.ne.s32.totalorder %s2526_s0, %s1546_s18  ;;  %s23_s15 = int_to_ptr.vmem [resolvable:$true] %s22_s15 }
  0x37   :  { %p1550_p11 = scmp.lt.u32.totalorder %s1546_s18, %s2526_s0 }
  0x39   :  { %p1552_p12 = pnand %p1550_p11, %p1547_p10 }
  0x3b   :  { %1555 = shalt.err (!%p1552_p12)
}
  0x3c   :  { %s1556_s1 = scalar_lea.vmem %s23_s15, 256  ;;  %p1561_p0 = scmp.lt.s32.totalorder %s23_s15, %s23_s15 }
  0x3d   :  { %p1557_p13 = scmp.ne.s32.totalorder %s23_s15, %s1556_s1  ;;  %p1562_p1 = scmp.lt.s32.totalorder %s1556_s1, %s1556_s1 }
  0x3f   :  { %p1563_p2 = por %p1562_p1, %p1561_p0 }
  0x41   :  { %p1564_p3 = pnand %p1563_p2, %p1557_p13 }
  0x43   :  { %1567 = shalt.err (!%p1564_p3)
}
  0x44   :  { %s1672_s5 = smov 32   ;;  %s1673_s23 = smov 2  }
  0x45   :  { %28 = dma.hbm_to_vmem [thread:$0]  %s2526_s0, 256, %s23_s15, [#allocation5], %s1672_s5, %s1672_s5, %s1673_s23  }
  0x46   :  { %s1674_s26 = smov [#allocation9]   ;;  %s1675_s29 = smov [#allocation12]  }
  0x47   :  { %s45_s28 = sshll.u32 %s1674_s26, 4  ;;  %s65_s30 = sshll.u32 %s1675_s29, 4  ;;  %s46_s28 = int_to_ptr.vmem [resolvable:$true] %s45_s28  ;;  %s66_s30 = int_to_ptr.vmem [resolvable:$true] %s65_s30 }
  0x48   :  { %s1568_s10 = scalar_lea.hbm %s2528_s2, 64 }
  0x49   :  { %p1569_p4 = scmp.ne.s32.totalorder %s2528_s2, %s1568_s10  ;;  %p1572_p5 = scmp.lt.u32.totalorder %s1568_s10, %s2528_s2 }
  0x4b   :  { %p1574_p6 = pnand %p1572_p5, %p1569_p4 }
  0x4d   :  { %1577 = shalt.err (!%p1574_p6)
}
  0x4e   :  { %s1578_s0 = scalar_lea.vmem %s46_s28, 64  ;;  %p1583_p8 = scmp.lt.s32.totalorder %s46_s28, %s46_s28 }
  0x4f   :  { %p1579_p7 = scmp.ne.s32.totalorder %s46_s28, %s1578_s0  ;;  %p1584_p9 = scmp.lt.s32.totalorder %s1578_s0, %s1578_s0 }
  0x51   :  { %p1585_p10 = por %p1584_p9, %p1583_p8 }
  0x53   :  { %p1586_p11 = pnand %p1585_p10, %p1579_p7 }
  0x55   :  { %1589 = shalt.err (!%p1586_p11)
}
  0x56   :  { %48 = dma.hbm_to_vmem [thread:$0]  %s2528_s2, 64, %s46_s28, [#allocation8]  }
  0x57   :  { %s1590_s19 = scalar_lea.hbm %s2530_s4, 64 }
  0x58   :  { %p1591_p12 = scmp.ne.s32.totalorder %s2530_s4, %s1590_s19  ;;  %p1594_p13 = scmp.lt.u32.totalorder %s1590_s19, %s2530_s4 }
  0x5a   :  { %p1596_p0 = pnand %p1594_p13, %p1591_p12 }
  0x5c   :  { %1599 = shalt.err (!%p1596_p0)
}
  0x5d   :  { %s1600_s24 = scalar_lea.vmem %s66_s30, 64  ;;  %p1605_p2 = scmp.lt.s32.totalorder %s66_s30, %s66_s30 }
  0x5e   :  { %p1601_p1 = scmp.ne.s32.totalorder %s66_s30, %s1600_s24  ;;  %p1606_p3 = scmp.lt.s32.totalorder %s1600_s24, %s1600_s24 }
  0x60   :  { %p1607_p4 = por %p1606_p3, %p1605_p2 }
  0x62   :  { %p1608_p5 = pnand %p1607_p4, %p1601_p1 }
  0x64   :  { %1611 = shalt.err (!%p1608_p5)
}
  0x65   :  { %68 = dma.hbm_to_vmem [thread:$0]  %s2530_s4, 64, %s66_s30, [#allocation11]  }
  0x66   :  { %s1676_s26 = smov [#allocation15]   ;;  %s1612_s9 = scalar_lea.hbm %s2532_s6, 128 }
  0x67   :  { %s86_s28 = sshll.u32 %s1676_s26, 4  ;;  %p1613_p6 = scmp.ne.s32.totalorder %s2532_s6, %s1612_s9  ;;  %s87_s28 = int_to_ptr.vmem [resolvable:$true] %s86_s28 }
  0x68   :  { %p1616_p7 = scmp.lt.u32.totalorder %s1612_s9, %s2532_s6 }
  0x6a   :  { %p1618_p8 = pnand %p1616_p7, %p1613_p6 }
  0x6c   :  { %1621 = shalt.err (!%p1618_p8)
}
  0x6d   :  { %s1622_s14 = scalar_lea.vmem %s87_s28, 128  ;;  %p1627_p10 = scmp.lt.s32.totalorder %s87_s28, %s87_s28 }
  0x6e   :  { %p1623_p9 = scmp.ne.s32.totalorder %s87_s28, %s1622_s14  ;;  %p1628_p11 = scmp.lt.s32.totalorder %s1622_s14, %s1622_s14 }
  0x70   :  { %p1629_p12 = por %p1628_p11, %p1627_p10 }
  0x72   :  { %p1630_p13 = pnand %p1629_p12, %p1623_p9 }
  0x74   :  { %1633 = shalt.err (!%p1630_p13)
}
  0x75   :  { %92 = dma.hbm_to_vmem [thread:$0]  %s2532_s6, 128, %s87_s28, [#allocation14], %s1669_s3, %s1669_s3, %s1670_s27  }
  0x76   :  { %1656 = dma.done.wait [#allocation5], 256  }
  0x77   :  { %1657 = vsyncadd [#allocation5], 4294967040 }
  0x78   :  { %1658 = dma.done.wait [#allocation8], 128  }
  0x79   :  { %1659 = vsyncadd [#allocation8], 4294967168 }
  0x7a   :  { %1660 = dma.done.wait [#allocation11], 128  }
  0x7b   :  { %1661 = vsyncadd [#allocation11], 4294967168 }
  0x7c   :  { %1662 = dma.done.wait [#allocation14], 256  }
  0x7d   :  { %1663 = vsyncadd [#allocation14], 4294967040  ;;  %v149_v0 = vlaneseq  ;;  %v1677_v1 = vmov 0.0   ;;  %v1678_v2 = vmov 1966171168   ;;  %vm204_vm0 = vcmask 1043456  }
  0x7e   :  { %118 = vst [vmem:[#allocation2] sm:$0xf] %v1677_v1  ;;  %119 = vst [vmem:[#allocation2 + $0x4] sm:$0xf] %v1677_v1  ;;  %v147_v3 = vunpack.c.l.s4 %v1678_v2  ;;  %v1815_v7 = vld [vmem:[#allocation7] sm:$0xf] }
  0x7f   :  { %120 = vst [vmem:[#allocation2 + $0x8] sm:$0xf] %v1677_v1  ;;  %121 = vst [vmem:[#allocation2 + $0xc] sm:$0xf] %v1677_v1  ;;  %v150_v4 = vshrl.u32 %v149_v0, 7  ;;  %vm221_vm1 = vcmask 1041409  }
  0x80   :  { %122 = vst [vmem:[#allocation3] sm:$0xf] %v1677_v1  ;;  %123 = vst [vmem:[#allocation3 + $0x4] sm:$0xf] %v1677_v1  ;;  %v148_v5 = vunpack.c.0.s8 %v147_v3  ;;  %v1817_v8 = vld [vmem:[#allocation9] sm:$0xf] }
  0x81   :  { %124 = vst [vmem:[#allocation3 + $0x8] sm:$0xf] %v1677_v1  ;;  %125 = vst [vmem:[#allocation3 + $0xc] sm:$0xf] %v1677_v1  ;;  %v1819_v9 = vsub.s32 0, %v150_v4  ;;  %s1679_s6 = smov [#allocation16]  }
  0x82   :  { %v1813_v6 = vsub.s32 %v148_v5, %v150_v4  ;;  %v1821_v12 = vld [vmem:[#allocation4] sm:$0x3]  ;;  %v1830_v17 = vld [vmem:[#allocation4 + $0x2] sm:$0x3]  ;;  %v1832_v18 = vld [vmem:[#allocation4 + $0x4] sm:$0x3] }
  0x83   :  { %v1834_v19 = vld.sshfl [vmem:[#allocation4 + $0x6] sm:$0x11 pattern:$0x75316420]  ;;  %v1855_v29 = vld [vmem:[#allocation10] sm:$0xf] }
  0x84   :  { %v1825_v13 = vrot.slane %v1821_v12, %v1813_v6  ;;  %v1839_v21 = vrot.slane %v1830_v17, %v1813_v6  ;;  %v1843_v22 = vrot.slane %v1832_v18, %v1813_v6  ;;  %v1845_v23 = vld.sshfl [vmem:[#allocation4 + $0x8] sm:$0x11 pattern:$0x75316420]  ;;  %v1857_v30 = vld [vmem:[#allocation12] sm:$0xf]  ;;  %v641_v34 = vrot.slane %v1834_v19, %v1813_v6 }
  0x85   :  { %v134_v10 = vld [vmem:[#allocation2] sm:$0xf]  ;;  %v1847_v24 = vld.sshfl [vmem:[#allocation4 + $0xa] sm:$0x11 pattern:$0x75316420]  ;;  %v801_v36 = vrot.slane %v1845_v23, %v1813_v6 }
  0x86   :  { %v168_v14 = vmul.f32 %v134_v10, %v1815_v7  ;;  %v190_v20 = vmul.f32 %v134_v10, %v1817_v8  ;;  %v1849_v25 = vld.sshfl [vmem:[#allocation4 + $0xc] sm:$0x11 pattern:$0x75316420]  ;;  %v160_v26 = vrot.slane %v1825_v13, %v1813_v6  ;;  %v321_v32 = vrot.slane %v1839_v21, %v1813_v6  ;;  %v1877_v45 = vld [vmem:[#allocation13] sm:$0xf] }
  0x87   :  { %v139_v11 = vld [vmem:[#allocation3] sm:$0xf]  ;;  %v1853_v28 = vld.sshfl [vmem:[#allocation4 + $0xe] sm:$0x11 pattern:$0x75316420]  ;;  %v481_v33 = vrot.slane %v1843_v22, %v1813_v6  ;;  %v961_v37 = vrot.slane %v1847_v24, %v1813_v6  ;;  %v658_v40 = vrot.slane %v641_v34, %v1819_v9  ;;  %v818_v43 = vrot.slane %v801_v36, %v1819_v9 }
  0x88   :  { %v170_v15 = vmul.f32 %v139_v11, %v1817_v8  ;;  %v188_v16 = vmul.f32 %v139_v11, %v1815_v7  ;;  %v177_v35 = vrot.slane %v160_v26, %v1819_v9  ;;  %v338_v38 = vrot.slane %v321_v32, %v1819_v9  ;;  %v1879_v46 = vld [vmem:[#allocation15] sm:$0xf]  ;;  %v135_v59 = vld [vmem:[#allocation2 + $0x4] sm:$0xf]  ;;  %v140_v60 = vld [vmem:[#allocation3 + $0x4] sm:$0xf] }
  0x89   :  { %v498_v39 = vrot.slane %v481_v33, %v1819_v9  ;;  %v978_v44 = vrot.slane %v961_v37, %v1819_v9  ;;  %v1886_v53 = vmul.f32 %v658_v40, %v1855_v29  ;;  %v1889_v54 = vmul.f32 %v658_v40, %v1857_v30  ;;  %s1437_s3 = sshll.u32 %s1679_s6, 4  ;;  %s1438_s3 = int_to_ptr.vmem [resolvable:$true] %s1437_s3 }
  0x8a   :  { %v172_v27 = vsub.f32 %v168_v14, %v170_v15  ;;  %v192_v31 = vadd.f32 %v190_v20, %v188_v16  ;;  %v184_v41 = vmul.f32 %v177_v35, %v1855_v29  ;;  %v194_v42 = vmul.f32 %v177_v35, %v1857_v30  ;;  %s1634_s27 = scalar_lea.vmem %s1438_s3, 256  ;;  %p1639_p1 = scmp.lt.s32.totalorder %s1438_s3, %s1438_s3 }
  0x8b   :  { %v345_v47 = vmul.f32 %v338_v38, %v1855_v29  ;;  %v355_v48 = vmul.f32 %v338_v38, %v1857_v30  ;;  %v505_v49 = vmul.f32 %v498_v39, %v1855_v29  ;;  %v515_v50 = vmul.f32 %v498_v39, %v1857_v30  ;;  %p1635_p0 = scmp.ne.s32.totalorder %s1438_s3, %s1634_s27  ;;  %p1640_p2 = scmp.lt.s32.totalorder %s1634_s27, %s1634_s27 }
  0x8c   :  { %v186_v51 = vadd.f32 %v184_v41, %v172_v27  ;;  %v196_v52 = vadd.f32 %v194_v42, %v192_v31  ;;  %v1892_v55 = vmul.f32 %v818_v43, %v1855_v29  ;;  %v1895_v56 = vmul.f32 %v818_v43, %v1857_v30 }
  0x8d   :  { %v1898_v57 = vmul.f32 %v978_v44, %v1855_v29  ;;  %v1901_v58 = vmul.f32 %v978_v44, %v1857_v30  ;;  %v1121_v3 = vrot.slane %v1849_v25, %v1813_v6  ;;  %v1281_v4 = vrot.slane %v1853_v28, %v1813_v6  ;;  %p1641_p3 = por %p1640_p2, %p1639_p1 }
  0x8e   :  { %v1904_v61 = vmul.f32 %v186_v51, %v1877_v45  ;;  %v1907_v62 = vmul.f32 %v196_v52, %v1879_v46  ;;  %v329_v63 = vmul.f32 %v186_v51, %v1815_v7  ;;  %v331_v0 = vmul.f32 %v196_v52, %v1817_v8 }
  0x8f   :  { %v349_v1 = vmul.f32 %v196_v52, %v1815_v7  ;;  %v351_v2 = vmul.f32 %v186_v51, %v1817_v8  ;;  %v153_v10 = vcombine.high %v1825_v13, %v1825_v13  ;;  %v169_v11 = vmul.f32 %v135_v59, %v1815_v7  ;;  %p1642_p4 = pnand %p1641_p3, %p1635_p0 }
  0x90   :  { %v333_v5 = vsub.f32 %v329_v63, %v331_v0  ;;  %v171_v14 = vmul.f32 %v140_v60, %v1817_v8  ;;  %v1138_v16 = vrot.slane %v1121_v3, %v1819_v9  ;;  %v1923_v20 = vrot.slane %v1281_v4, %v1819_v9 }
  0x91   :  { %v353_v15 = vadd.f32 %v351_v2, %v349_v1  ;;  %v189_v26 = vmul.f32 %v140_v60, %v1815_v7  ;;  %v167_v31 = vrot.slane %v153_v10, %v1813_v6  ;;  %v191_v33 = vmul.f32 %v135_v59, %v1817_v8 }
  0x92   :  { %v1926_v27 = vadd.f32 %v345_v47, %v333_v5  ;;  %v173_v32 = vsub.f32 %v169_v11, %v171_v14  ;;  %v1933_v34 = vmul.f32 %v1138_v16, %v1855_v29  ;;  %v1936_v35 = vmul.f32 %v1138_v16, %v1857_v30 }
  0x93   :  { %v1930_v13 = vadd.f32 %v355_v48, %v353_v15  ;;  %v1940_v36 = vmul.f32 %v1923_v20, %v1855_v29  ;;  %v181_v39 = vrot.slane %v167_v31, %v1819_v9  ;;  %v193_v40 = vadd.f32 %v191_v33, %v189_v26 }
  0x94   :  { %v489_v37 = vmul.f32 %v1926_v27, %v1815_v7  ;;  %v511_v38 = vmul.f32 %v1926_v27, %v1817_v8  ;;  %v314_v43 = vcombine.high %v1839_v21, %v1839_v21  ;;  %v474_v44 = vcombine.high %v1843_v22, %v1843_v22 }
  0x95   :  { %v491_v41 = vmul.f32 %v1930_v13, %v1817_v8  ;;  %v509_v42 = vmul.f32 %v1930_v13, %v1815_v7  ;;  %v185_v47 = vmul.f32 %v181_v39, %v1855_v29  ;;  %v195_v48 = vmul.f32 %v181_v39, %v1857_v30 }
  0x96   :  { %v634_v51 = vcombine.high %v1834_v19, %v1834_v19  ;;  %v794_v52 = vcombine.high %v1845_v23, %v1845_v23  ;;  %v328_v63 = vrot.slane %v314_v43, %v1813_v6  ;;  %v488_v0 = vrot.slane %v474_v44, %v1813_v6 }
  0x97   :  { %v493_v59 = vsub.f32 %v489_v37, %v491_v41  ;;  %v513_v60 = vadd.f32 %v511_v38, %v509_v42  ;;  %v187_v21 = vadd.f32 %v185_v47, %v173_v32  ;;  %v197_v1 = vadd.f32 %v195_v48, %v193_v40 }
  0x98   :  { %v648_v22 = vrot.slane %v634_v51, %v1813_v6  ;;  %v808_v2 = vrot.slane %v794_v52, %v1813_v6  ;;  %v342_v19 = vrot.slane %v328_v63, %v1819_v9  ;;  %v502_v23 = vrot.slane %v488_v0, %v1819_v9 }
  0x99   :  { %v1965_v3 = vadd.f32 %v505_v49, %v493_v59  ;;  %v1967_v4 = vadd.f32 %v515_v50, %v513_v60  ;;  %v1972_v5 = vmul.f32 %v187_v21, %v1877_v45  ;;  %v1975_v10 = vmul.f32 %v197_v1, %v1879_v46 }
  0x9a   :  { %v330_v11 = vmul.f32 %v187_v21, %v1815_v7  ;;  %v332_v14 = vmul.f32 %v197_v1, %v1817_v8  ;;  %v346_v31 = vmul.f32 %v342_v19, %v1855_v29  ;;  %v350_v32 = vmul.f32 %v197_v1, %v1815_v7 }
  0x9b   :  { %v649_v49 = vmul.f32 %v1965_v3, %v1815_v7  ;;  %v651_v50 = vmul.f32 %v1967_v4, %v1817_v8  ;;  %v669_v15 = vmul.f32 %v1967_v4, %v1815_v7  ;;  %v671_v16 = vmul.f32 %v1965_v3, %v1817_v8 }
  0x9c   :  { %v334_v26 = vsub.f32 %v330_v11, %v332_v14  ;;  %v352_v33 = vmul.f32 %v187_v21, %v1817_v8  ;;  %v356_v39 = vmul.f32 %v342_v19, %v1857_v30  ;;  %v506_v40 = vmul.f32 %v502_v23, %v1855_v29 }
  0x9d   :  { %v653_v37 = vsub.f32 %v649_v49, %v651_v50  ;;  %v673_v38 = vadd.f32 %v671_v16, %v669_v15  ;;  %v516_v43 = vmul.f32 %v502_v23, %v1857_v30  ;;  %v662_v44 = vrot.slane %v648_v22, %v1819_v9 }
  0x9e   :  { %v1992_v41 = vadd.f32 %v346_v31, %v334_v26  ;;  %v354_v42 = vadd.f32 %v352_v33, %v350_v32  ;;  %v822_v51 = vrot.slane %v808_v2, %v1819_v9  ;;  %v954_v52 = vcombine.high %v1847_v24, %v1847_v24 }
  0x9f   :  { %v1997_v47 = vadd.f32 %v1886_v53, %v653_v37  ;;  %v2000_v48 = vadd.f32 %v1889_v54, %v673_v38  ;;  %v666_v0 = vmul.f32 %v662_v44, %v1855_v29  ;;  %v676_v2 = vmul.f32 %v662_v44, %v1857_v30 }
  0xa0   :  { %v2005_v59 = vadd.f32 %v356_v39, %v354_v42  ;;  %v490_v60 = vmul.f32 %v1992_v41, %v1815_v7  ;;  %v512_v63 = vmul.f32 %v1992_v41, %v1817_v8  ;;  %v2026_v19 = vmul.f32 %v822_v51, %v1855_v29 }
  0xa1   :  { %v809_v53 = vmul.f32 %v1997_v47, %v1815_v7  ;;  %v811_v54 = vmul.f32 %v2000_v48, %v1817_v8  ;;  %v829_v21 = vmul.f32 %v2000_v48, %v1815_v7  ;;  %v831_v24 = vmul.f32 %v1997_v47, %v1817_v8 }
  0xa2   :  { %v492_v1 = vmul.f32 %v2005_v59, %v1817_v8  ;;  %v510_v22 = vmul.f32 %v2005_v59, %v1815_v7  ;;  %v2029_v14 = vmul.f32 %v822_v51, %v1857_v30  ;;  %v968_v49 = vrot.slane %v954_v52, %v1813_v6 }
  0xa3   :  { %v813_v23 = vsub.f32 %v809_v53, %v811_v54  ;;  %v833_v11 = vadd.f32 %v831_v24, %v829_v21  ;;  %v1114_v16 = vcombine.high %v1849_v25, %v1849_v25  ;;  %v1274_v26 = vcombine.high %v1853_v28, %v1853_v28 }
  0xa4   :  { %v494_v50 = vsub.f32 %v490_v60, %v492_v1  ;;  %v514_v15 = vadd.f32 %v512_v63, %v510_v22  ;;  %v982_v33 = vrot.slane %v968_v49, %v1819_v9  ;;  %v2041_v37 = vmul.f32 %v1923_v20, %v1857_v30 }
  0xa5   :  { %v827_v31 = vadd.f32 %v1892_v55, %v813_v23  ;;  %v837_v32 = vadd.f32 %v1895_v56, %v833_v11  ;;  %v1128_v42 = vrot.slane %v1114_v16, %v1813_v6  ;;  %v1288_v25 = vrot.slane %v1274_v26, %v1813_v6 }
  0xa6   :  { %v2043_v38 = vadd.f32 %v506_v40, %v494_v50  ;;  %v2045_v39 = vadd.f32 %v516_v43, %v514_v15  ;;  %v2064_v24 = vmul.f32 %v982_v33, %v1855_v29  ;;  %v2067_v1 = vmul.f32 %v982_v33, %v1857_v30 }
  0xa7   :  { %v839_v28 = vmul.f32 %v827_v31, %v1877_v45  ;;  %v841_v55 = vmul.f32 %v837_v32, %v1879_v46  ;;  %v969_v56 = vmul.f32 %v827_v31, %v1815_v7  ;;  %v971_v44 = vmul.f32 %v837_v32, %v1817_v8 }
  0xa8   :  { %v989_v51 = vmul.f32 %v837_v32, %v1815_v7  ;;  %v991_v20 = vmul.f32 %v827_v31, %v1817_v8  ;;  %v650_v40 = vmul.f32 %v2043_v38, %v1815_v7  ;;  %v652_v43 = vmul.f32 %v2045_v39, %v1817_v8 }
  0xa9   :  { %v843_v52 = vsub.f32 %v839_v28, %v841_v55  ;;  %v973_v60 = vsub.f32 %v969_v56, %v971_v44  ;;  %v670_v63 = vmul.f32 %v2045_v39, %v1815_v7  ;;  %v672_v53 = vmul.f32 %v2043_v38, %v1817_v8 }
  0xaa   :  { %v993_v54 = vadd.f32 %v991_v20, %v989_v51  ;;  %v654_v21 = vsub.f32 %v650_v40, %v652_v43  ;;  %v1142_v49 = vrot.slane %v1128_v42, %v1819_v9  ;;  %v1302_v26 = vrot.slane %v1288_v25, %v1819_v9 }
  0xab   :  { %v2070_v22 = vsel %vm204_vm0, %v843_v52, 0.0  ;;  %v987_v23 = vadd.f32 %v1898_v57, %v973_v60  ;;  %v674_v11 = vadd.f32 %v672_v53, %v670_v63 }
  0xac   :  { %v846_v50 = vrot.slane %v2070_v22, 4  ;;  %v997_v15 = vadd.f32 %v1901_v58, %v993_v54  ;;  %v2076_v16 = vadd.f32 %v666_v0, %v654_v21  ;;  %v2099_v40 = vmul.f32 %v1142_v49, %v1857_v30 }
  0xad   :  { %v999_v31 = vmul.f32 %v987_v23, %v1877_v45  ;;  %v1129_v32 = vmul.f32 %v987_v23, %v1815_v7  ;;  %v1151_v33 = vmul.f32 %v987_v23, %v1817_v8  ;;  %v2082_v28 = vadd.f32 %v676_v2, %v674_v11 }
  0xae   :  { %v1001_v57 = vmul.f32 %v997_v15, %v1879_v46  ;;  %v1131_v42 = vmul.f32 %v997_v15, %v1817_v8  ;;  %v1149_v55 = vmul.f32 %v997_v15, %v1815_v7  ;;  %v810_v58 = vmul.f32 %v2076_v16, %v1815_v7 }
  0xaf   :  { %v812_v0 = vmul.f32 %v2082_v28, %v1817_v8  ;;  %v830_v25 = vmul.f32 %v2082_v28, %v1815_v7  ;;  %v832_v56 = vmul.f32 %v2076_v16, %v1817_v8  ;;  %v2096_v2 = vmul.f32 %v1142_v49, %v1855_v29 }
  0xb0   :  { %v1003_v44 = vsub.f32 %v999_v31, %v1001_v57  ;;  %v1133_v51 = vsub.f32 %v1129_v32, %v1131_v42  ;;  %v1153_v20 = vadd.f32 %v1151_v33, %v1149_v55  ;;  %v2102_v60 = vmul.f32 %v1302_v26, %v1855_v29 }
  0xb1   :  { %v814_v43 = vsub.f32 %v810_v58, %v812_v0  ;;  %v834_v52 = vadd.f32 %v832_v56, %v830_v25  ;;  %v2105_v63 = vmul.f32 %v1302_v26, %v1857_v30  ;;  %v202_v23 = vsub.f32 %v1904_v61, %v1907_v62 }
  0xb2   :  { %v1005_v53 = vsel %vm204_vm0, %v1003_v44, 0.0  ;;  %v1147_v54 = vadd.f32 %v1933_v34, %v1133_v51  ;;  %v1157_v21 = vadd.f32 %v1936_v35, %v1153_v20  ;;  %v203_v31 = vsub.f32 %v1972_v5, %v1975_v10 }
  0xb3   :  { %v1006_v11 = vrot.slane %v1005_v53, 4  ;;  %v828_v49 = vadd.f32 %v2026_v19, %v814_v43  ;;  %v838_v15 = vadd.f32 %v2029_v14, %v834_v52 }
  0xb4   :  { %v1159_v26 = vmul.f32 %v1147_v54, %v1877_v45  ;;  %v1161_v32 = vmul.f32 %v1157_v21, %v1879_v46  ;;  %v1289_v33 = vmul.f32 %v1147_v54, %v1815_v7  ;;  %v1291_v34 = vmul.f32 %v1157_v21, %v1817_v8 }
  0xb5   :  { %v1007_v35 = vadd.f32 %v1006_v11, %v1005_v53  ;;  %v840_v57 = vmul.f32 %v828_v49, %v1877_v45  ;;  %v842_v61 = vmul.f32 %v838_v15, %v1879_v46  ;;  %v970_v62 = vmul.f32 %v828_v49, %v1815_v7 }
  0xb6   :  { %v1163_v19 = vsub.f32 %v1159_v26, %v1161_v32  ;;  %v1293_v14 = vsub.f32 %v1289_v33, %v1291_v34  ;;  %v972_v42 = vmul.f32 %v838_v15, %v1817_v8  ;;  %v990_v5 = vmul.f32 %v838_v15, %v1815_v7 }
  0xb7   :  { %v1008_v10 = vrot.slane %v1007_v35, 2  ;;  %v844_v55 = vsub.f32 %v840_v57, %v842_v61  ;;  %v992_v58 = vmul.f32 %v828_v49, %v1817_v8  ;;  %v1309_v0 = vmul.f32 %v1157_v21, %v1815_v7 }
  0xb8   :  { %v1165_v25 = vsel %vm204_vm0, %v1163_v19, 0.0  ;;  %v1307_v56 = vadd.f32 %v1940_v36, %v1293_v14  ;;  %v974_v44 = vsub.f32 %v970_v62, %v972_v42  ;;  %v1311_v51 = vmul.f32 %v1147_v54, %v1817_v8  ;;  %v2146_v14 = vld [vmem:[#allocation2 + $0x8] sm:$0xf] }
  0xb9   :  { %v1009_v20 = vadd.f32 %v1008_v10, %v1007_v35  ;;  %v1166_v43 = vrot.slane %v1165_v25, 4  ;;  %v2131_v52 = vsel %vm204_vm0, %v844_v55, 0.0  ;;  %v994_v53 = vadd.f32 %v992_v58, %v990_v5 }
  0xba   :  { %v1319_v11 = vmul.f32 %v1307_v56, %v1877_v45  ;;  %1424 = vst [vmem:[#allocation2] sm:$0xf] %v1307_v56  ;;  %v853_v49 = vrot.slane %v2131_v52, 4  ;;  %v988_v21 = vadd.f32 %v2064_v24, %v974_v44  ;;  %v1313_v15 = vadd.f32 %v1311_v51, %v1309_v0 }
  0xbb   :  { %v1010_v26 = vrot.slane %v1009_v20, 1  ;;  %v1167_v32 = vadd.f32 %v1166_v43, %v1165_v25  ;;  %v998_v36 = vadd.f32 %v2067_v1, %v994_v53  ;;  %v205_v54 = vsel %vm204_vm0, %v202_v23, 0.0 }
  0xbc   :  { %v1000_v33 = vmul.f32 %v988_v21, %v1877_v45  ;;  %v1130_v34 = vmul.f32 %v988_v21, %v1815_v7  ;;  %v1152_v35 = vmul.f32 %v988_v21, %v1817_v8  ;;  %v1317_v57 = vadd.f32 %v2041_v37, %v1313_v15 }
  0xbd   :  { %v2142_v61 = vadd.f32 %v1010_v26, %v1009_v20  ;;  %v1168_v62 = vrot.slane %v1167_v32, 2  ;;  %v1002_v24 = vmul.f32 %v998_v36, %v1879_v46  ;;  %v1132_v19 = vmul.f32 %v998_v36, %v1817_v8 }
  0xbe   :  { %v1150_v1 = vmul.f32 %v998_v36, %v1815_v7  ;;  %v1321_v23 = vmul.f32 %v1317_v57, %v1879_v46  ;;  %1426 = vst [vmem:[#allocation3] sm:$0xf] %v1317_v57  ;;  %v206_v42 = vrot.slane %v205_v54, 4  ;;  %v212_v5 = vsel %vm204_vm0, %v203_v31, 0.0 }
  0xbf   :  { %v1169_v10 = vadd.f32 %v1168_v62, %v1167_v32  ;;  %v1004_v55 = vsub.f32 %v1000_v33, %v1002_v24  ;;  %v1134_v37 = vsub.f32 %v1130_v34, %v1132_v19  ;;  %v213_v58 = vrot.slane %v212_v5, 4  ;;  %v138_v33 = vld [vmem:[#allocation2 + $0xc] sm:$0xf]  ;;  %v142_v24 = vld [vmem:[#allocation3 + $0x8] sm:$0xf] }
  0xc0   :  { %v1154_v0 = vadd.f32 %v1152_v35, %v1150_v1  ;;  %v1323_v25 = vsub.f32 %v1319_v11, %v1321_v23  ;;  %v207_v56 = vadd.f32 %v206_v42, %v205_v54  ;;  %v2153_v44 = vmul.f32 %v2146_v14, %v1815_v7 }
  0xc1   :  { %v1170_v51 = vrot.slane %v1169_v10, 1  ;;  %v1012_v20 = vsel %vm204_vm0, %v1004_v55, 0.0  ;;  %v1148_v43 = vadd.f32 %v2096_v2, %v1134_v37  ;;  %v214_v53 = vadd.f32 %v213_v58, %v212_v5  ;;  %v143_v58 = vld [vmem:[#allocation3 + $0xc] sm:$0xf] }
  0xc2   :  { %v1013_v21 = vrot.slane %v1012_v20, 4  ;;  %v1158_v31 = vadd.f32 %v2099_v40, %v1154_v0  ;;  %v1325_v15 = vsel %vm204_vm0, %v1323_v25, 0.0  ;;  %v208_v26 = vrot.slane %v207_v56, 2 }
  0xc3   :  { %v2159_v32 = vadd.f32 %v1170_v51, %v1169_v10  ;;  %v1160_v11 = vmul.f32 %v1148_v43, %v1877_v45  ;;  %v1290_v36 = vmul.f32 %v1148_v43, %v1815_v7  ;;  %v1326_v54 = vrot.slane %v1325_v15, 4 }
  0xc4   :  { %v1014_v34 = vadd.f32 %v1013_v21, %v1012_v20  ;;  %v1162_v35 = vmul.f32 %v1158_v31, %v1879_v46  ;;  %v1292_v2 = vmul.f32 %v1158_v31, %v1817_v8  ;;  %v1310_v57 = vmul.f32 %v1158_v31, %v1815_v7 }
  0xc5   :  { %v1327_v40 = vadd.f32 %v1326_v54, %v1325_v15  ;;  %v1312_v62 = vmul.f32 %v1148_v43, %v1817_v8  ;;  %v209_v19 = vadd.f32 %v208_v26, %v207_v56  ;;  %v215_v1 = vrot.slane %v214_v53, 2 }
  0xc6   :  { %v1015_v23 = vrot.slane %v1014_v34, 2  ;;  %v1164_v42 = vsub.f32 %v1160_v11, %v1162_v35  ;;  %v1294_v5 = vsub.f32 %v1290_v36, %v1292_v2  ;;  %v2168_v10 = vmul.f32 %v138_v33, %v1815_v7 }
  0xc7   :  { %v1328_v55 = vrot.slane %v1327_v40, 2  ;;  %v1314_v37 = vadd.f32 %v1312_v62, %v1310_v57  ;;  %v210_v0 = vrot.slane %v209_v19, 1  ;;  %v216_v25 = vadd.f32 %v215_v1, %v214_v53 }
  0xc8   :  { %v1016_v51 = vadd.f32 %v1015_v23, %v1014_v34  ;;  %v1172_v20 = vsel %vm204_vm0, %v1164_v42, 0.0  ;;  %v1308_v21 = vadd.f32 %v2102_v60, %v1294_v5  ;;  %v2173_v43 = vmul.f32 %v142_v24, %v1817_v8 }
  0xc9   :  { %v1173_v56 = vrot.slane %v1172_v20, 4  ;;  %v1329_v31 = vadd.f32 %v1328_v55, %v1327_v40  ;;  %v1318_v15 = vadd.f32 %v2105_v63, %v1314_v37  ;;  %v211_v26 = vadd.f32 %v210_v0, %v209_v19 }
  0xca   :  { %v1017_v11 = vrot.slane %v1016_v51, 1  ;;  %v1320_v36 = vmul.f32 %v1308_v21, %v1877_v45  ;;  %1425 = vst [vmem:[#allocation2 + $0x4] sm:$0xf] %v1308_v21  ;;  %v217_v54 = vrot.slane %v216_v25, 1  ;;  %v2178_v53 = vmul.f32 %v143_v58, %v1817_v8 }
  0xcb   :  { %v1174_v34 = vadd.f32 %v1173_v56, %v1172_v20  ;;  %v1330_v35 = vrot.slane %v1329_v31, 1  ;;  %v1322_v60 = vmul.f32 %v1318_v15, %v1879_v46  ;;  %1427 = vst [vmem:[#allocation3 + $0x4] sm:$0xf] %v1318_v15  ;;  %v252_v2 = vsub.f32 %v2153_v44, %v2173_v43 }
  0xcc   :  { %v2183_v57 = vadd.f32 %v1017_v11, %v1016_v51  ;;  %v218_v63 = vadd.f32 %v217_v54, %v216_v25  ;;  %v253_v40 = vsub.f32 %v2168_v10, %v2178_v53  ;;  %v268_v62 = vmul.f32 %v142_v24, %v1815_v7 }
  0xcd   :  { %v1175_v19 = vrot.slane %v1174_v34, 2  ;;  %v2188_v1 = vadd.f32 %v1330_v35, %v1329_v31  ;;  %v1324_v23 = vsub.f32 %v1320_v36, %v1322_v60  ;;  %v269_v42 = vmul.f32 %v143_v58, %v1815_v7 }
  0xce   :  { %v222_v5 = vsel %vm221_vm1, %v218_v63, %v211_v26  ;;  %v270_v55 = vmul.f32 %v2146_v14, %v1817_v8  ;;  %v271_v44 = vmul.f32 %v138_v33, %v1817_v8  ;;  %v359_v37 = vmul.f32 %v1926_v27, %v1877_v45 }
  0xcf   :  { %v1176_v0 = vadd.f32 %v1175_v19, %v1174_v34  ;;  %v1332_v10 = vsel %vm204_vm0, %v1324_v23, 0.0  ;;  %v2199_v24 = vadd.f32 %v222_v5, %v1821_v12  ;;  %v360_v25 = vmul.f32 %v1992_v41, %v1877_v45  ;;  %v2225_v19 = vld [vmem:[#allocation13 + $0x4] sm:$0xf] }
  0xd0   :  { %v1333_v58 = vrot.slane %v1332_v10, 4  ;;  %v272_v51 = vadd.f32 %v270_v55, %v268_v62  ;;  %v273_v20 = vadd.f32 %v271_v44, %v269_v42  ;;  %v361_v14 = vmul.f32 %v1930_v13, %v1879_v46  ;;  %v2230_v44 = vld [vmem:[#allocation15 + $0x4] sm:$0xf] }
  0xd1   :  { %v1177_v21 = vrot.slane %v1176_v0, 1  ;;  %v232_v33 = vrot.slane %v2199_v24, %v1813_v6  ;;  %v362_v27 = vmul.f32 %v2005_v59, %v1879_v46  ;;  %v519_v12 = vmul.f32 %v1965_v3, %v1877_v45 }
  0xd2   :  { %v1334_v43 = vadd.f32 %v1333_v58, %v1332_v10  ;;  %v363_v56 = vsub.f32 %v359_v37, %v361_v14  ;;  %v520_v41 = vmul.f32 %v2043_v38, %v1877_v45  ;;  %v521_v31 = vmul.f32 %v1967_v4, %v1879_v46 }
  0xd3   :  { %v2215_v15 = vadd.f32 %v1177_v21, %v1176_v0  ;;  %v233_v13 = vcombine.high %v232_v33, %v232_v33  ;;  %v240_v26 = vrot.slane %v232_v33, %v1813_v6  ;;  %v364_v11 = vsub.f32 %v360_v25, %v362_v27 }
  0xd4   :  { %v1335_v36 = vrot.slane %v1334_v43, 2  ;;  %v365_v59 = vsel %vm204_vm0, %v363_v56, 0.0  ;;  %v522_v3 = vmul.f32 %v2045_v39, %v1879_v46  ;;  %v523_v54 = vsub.f32 %v519_v12, %v521_v31 }
  0xd5   :  { %v247_v53 = vrot.slane %v233_v13, %v1813_v6  ;;  %v257_v38 = vrot.slane %v240_v26, %v1819_v9  ;;  %v366_v34 = vrot.slane %v365_v59, 4  ;;  %v372_v4 = vsel %vm204_vm0, %v364_v11, 0.0 }
  0xd6   :  { %v1336_v35 = vadd.f32 %v1335_v36, %v1334_v43  ;;  %v373_v60 = vrot.slane %v372_v4, 4  ;;  %v524_v63 = vsub.f32 %v520_v41, %v522_v3  ;;  %v525_v62 = vsel %vm204_vm0, %v523_v54, 0.0 }
  0xd7   :  { %v261_v23 = vrot.slane %v247_v53, %v1819_v9  ;;  %v264_v42 = vmul.f32 %v257_v38, %v1855_v29  ;;  %v274_v39 = vmul.f32 %v257_v38, %v1857_v30  ;;  %v367_v5 = vadd.f32 %v366_v34, %v365_v59 }
  0xd8   :  { %v1337_v55 = vrot.slane %v1336_v35, 1  ;;  %v374_v37 = vadd.f32 %v373_v60, %v372_v4  ;;  %v526_v0 = vrot.slane %v525_v62, 4  ;;  %v532_v10 = vsel %vm204_vm0, %v524_v63, 0.0 }
  0xd9   :  { %v265_v25 = vmul.f32 %v261_v23, %v1855_v29  ;;  %v266_v58 = vadd.f32 %v264_v42, %v252_v2  ;;  %v275_v14 = vmul.f32 %v261_v23, %v1857_v30  ;;  %v276_v21 = vadd.f32 %v274_v39, %v272_v51 }
  0xda   :  { %v2235_v33 = vadd.f32 %v1337_v55, %v1336_v35  ;;  %v368_v27 = vrot.slane %v367_v5, 2  ;;  %v375_v12 = vrot.slane %v374_v37, 2  ;;  %v527_v43 = vadd.f32 %v526_v0, %v525_v62 }
  0xdb   :  { %v267_v56 = vadd.f32 %v265_v25, %v253_v40  ;;  %v277_v41 = vadd.f32 %v275_v14, %v273_v20  ;;  %v278_v31 = vmul.f32 %v266_v58, %v2225_v19  ;;  %v280_v13 = vmul.f32 %v276_v21, %v2230_v44 }
  0xdc   :  { %v369_v26 = vadd.f32 %v368_v27, %v367_v5  ;;  %v376_v11 = vadd.f32 %v375_v12, %v374_v37  ;;  %v2240_v36 = vmul.f32 %v266_v58, %v1815_v7  ;;  %v2243_v2 = vmul.f32 %v276_v21, %v1817_v8 }
  0xdd   :  { %v279_v51 = vmul.f32 %v267_v56, %v2225_v19  ;;  %v281_v59 = vmul.f32 %v277_v41, %v2230_v44  ;;  %v282_v3 = vsub.f32 %v278_v31, %v280_v13  ;;  %v2248_v40 = vmul.f32 %v267_v56, %v1815_v7 }
  0xde   :  { %v370_v20 = vrot.slane %v369_v26, 1  ;;  %v377_v54 = vrot.slane %v376_v11, 1  ;;  %v2251_v53 = vmul.f32 %v277_v41, %v1817_v8  ;;  %v411_v38 = vsub.f32 %v2240_v36, %v2243_v2 }
  0xdf   :  { %v283_v34 = vsub.f32 %v279_v51, %v281_v59  ;;  %v284_v4 = vsel %vm204_vm0, %v282_v3, 0.0  ;;  %v427_v35 = vmul.f32 %v276_v21, %v1815_v7  ;;  %v428_v60 = vmul.f32 %v277_v41, %v1815_v7 }
  0xe0   :  { %v285_v63 = vrot.slane %v284_v4, 4  ;;  %v371_v62 = vadd.f32 %v370_v20, %v369_v26  ;;  %v378_v23 = vadd.f32 %v377_v54, %v376_v11  ;;  %v412_v42 = vsub.f32 %v2248_v40, %v2251_v53 }
  0xe1   :  { %v291_v39 = vsel %vm204_vm0, %v283_v34, 0.0  ;;  %v429_v5 = vmul.f32 %v266_v58, %v1817_v8  ;;  %v430_v55 = vmul.f32 %v267_v56, %v1817_v8  ;;  %v528_v37 = vrot.slane %v527_v43, 2 }
  0xe2   :  { %v286_v0 = vadd.f32 %v285_v63, %v284_v4  ;;  %v292_v25 = vrot.slane %v291_v39, 4  ;;  %v381_v14 = vsel %vm221_vm1, %v378_v23, %v371_v62  ;;  %v533_v21 = vrot.slane %v532_v10, 4 }
  0xe3   :  { %v2265_v27 = vadd.f32 %v381_v14, %v1830_v17  ;;  %v431_v12 = vadd.f32 %v429_v5, %v427_v35  ;;  %v432_v41 = vadd.f32 %v430_v55, %v428_v60  ;;  %v529_v31 = vadd.f32 %v528_v37, %v527_v43 }
  0xe4   :  { %v287_v13 = vrot.slane %v286_v0, 2  ;;  %v293_v26 = vadd.f32 %v292_v25, %v291_v39  ;;  %v534_v11 = vadd.f32 %v533_v21, %v532_v10  ;;  %v679_v58 = vmul.f32 %v1997_v47, %v1877_v45 }
  0xe5   :  { %v391_v56 = vrot.slane %v2265_v27, %v1813_v6  ;;  %v530_v36 = vrot.slane %v529_v31, 1  ;;  %v680_v2 = vmul.f32 %v2076_v16, %v1877_v45  ;;  %v681_v17 = vmul.f32 %v2000_v48, %v1879_v46 }
  0xe6   :  { %v288_v51 = vadd.f32 %v287_v13, %v286_v0  ;;  %v294_v59 = vrot.slane %v293_v26, 2  ;;  %v535_v3 = vrot.slane %v534_v11, 2  ;;  %v682_v43 = vmul.f32 %v2082_v28, %v1879_v46 }
  0xe7   :  { %v392_v10 = vcombine.high %v391_v56, %v391_v56  ;;  %v399_v40 = vrot.slane %v391_v56, %v1813_v6  ;;  %v531_v47 = vadd.f32 %v530_v36, %v529_v31  ;;  %v683_v20 = vsub.f32 %v679_v58, %v681_v17 }
  0xe8   :  { %v289_v54 = vrot.slane %v288_v51, 1  ;;  %v295_v53 = vadd.f32 %v294_v59, %v293_v26  ;;  %v536_v34 = vadd.f32 %v535_v3, %v534_v11  ;;  %v684_v4 = vsub.f32 %v680_v2, %v682_v43 }
  0xe9   :  { %v406_v45 = vrot.slane %v392_v10, %v1813_v6  ;;  %v416_v16 = vrot.slane %v399_v40, %v1819_v9  ;;  %v685_v48 = vsel %vm204_vm0, %v683_v20, 0.0  ;;  %v2284_v35 = vadd.f32 %v846_v50, %v2070_v22 }
  0xea   :  { %v290_v46 = vadd.f32 %v289_v54, %v288_v51  ;;  %v296_v28 = vrot.slane %v295_v53, 1  ;;  %v537_v60 = vrot.slane %v536_v34, 1  ;;  %v686_v63 = vrot.slane %v685_v48, 4 }
  0xeb   :  { %v420_v62 = vrot.slane %v406_v45, %v1819_v9  ;;  %v423_v23 = vmul.f32 %v416_v16, %v1855_v29  ;;  %v433_v39 = vmul.f32 %v416_v16, %v1857_v30  ;;  %v692_v5 = vsel %vm204_vm0, %v684_v4, 0.0 }
  0xec   :  { %v297_v55 = vadd.f32 %v296_v28, %v295_v53  ;;  %v538_v37 = vadd.f32 %v537_v60, %v536_v34  ;;  %v687_v0 = vadd.f32 %v686_v63, %v685_v48  ;;  %v693_v25 = vrot.slane %v692_v5, 4 }
  0xed   :  { %v424_v14 = vmul.f32 %v420_v62, %v1855_v29  ;;  %v425_v22 = vadd.f32 %v423_v23, %v411_v38  ;;  %v434_v50 = vmul.f32 %v420_v62, %v1857_v30  ;;  %v435_v21 = vadd.f32 %v433_v39, %v431_v12 }
  0xee   :  { %v300_v31 = vsel %vm221_vm1, %v297_v55, %v290_v46  ;;  %v541_v13 = vsel %vm221_vm1, %v538_v37, %v531_v47  ;;  %v688_v26 = vrot.slane %v687_v0, 2  ;;  %v694_v11 = vadd.f32 %v693_v25, %v692_v5 }
  0xef   :  { %v302_v58 = vadd.f32 %v300_v31, %v2199_v24  ;;  %v426_v56 = vadd.f32 %v424_v14, %v412_v42  ;;  %v436_v36 = vadd.f32 %v434_v50, %v432_v41  ;;  %v437_v2 = vmul.f32 %v425_v22, %v2225_v19 }
  0xf0   :  { %v439_v17 = vmul.f32 %v435_v21, %v2230_v44  ;;  %v2298_v51 = vadd.f32 %v541_v13, %v1832_v18  ;;  %v567_v38 = vmul.f32 %v425_v22, %v1815_v7  ;;  %v569_v12 = vmul.f32 %v435_v21, %v1817_v8 }
  0xf1   :  { %303 = vst [vmem:[#allocation16] sm:$0x3] %v302_v58  ;;  %v438_v59 = vmul.f32 %v426_v56, %v2225_v19  ;;  %v440_v3 = vmul.f32 %v436_v36, %v2230_v44  ;;  %v568_v24 = vmul.f32 %v426_v56, %v1815_v7  ;;  %v570_v42 = vmul.f32 %v436_v36, %v1817_v8 }
  0xf2   :  { %v441_v41 = vsub.f32 %v437_v2, %v439_v17  ;;  %v551_v43 = vrot.slane %v2298_v51, %v1813_v6  ;;  %v571_v10 = vsub.f32 %v567_v38, %v569_v12  ;;  %v587_v18 = vmul.f32 %v435_v21, %v1815_v7 }
  0xf3   :  { %v442_v40 = vsub.f32 %v438_v59, %v440_v3  ;;  %v572_v47 = vsub.f32 %v568_v24, %v570_v42  ;;  %v588_v20 = vmul.f32 %v436_v36, %v1815_v7  ;;  %v589_v54 = vmul.f32 %v425_v22, %v1817_v8 }
  0xf4   :  { %v443_v53 = vsel %vm204_vm0, %v441_v41, 0.0  ;;  %v552_v34 = vcombine.high %v551_v43, %v551_v43  ;;  %v559_v4 = vrot.slane %v551_v43, %v1813_v6  ;;  %v590_v45 = vmul.f32 %v426_v56, %v1817_v8 }
  0xf5   :  { %v444_v16 = vrot.slane %v443_v53, 4  ;;  %v450_v48 = vsel %vm204_vm0, %v442_v40, 0.0  ;;  %v591_v46 = vadd.f32 %v589_v54, %v587_v18  ;;  %v689_v28 = vadd.f32 %v688_v26, %v687_v0 }
  0xf6   :  { %v451_v60 = vrot.slane %v450_v48, 4  ;;  %v566_v63 = vrot.slane %v552_v34, %v1813_v6  ;;  %v576_v62 = vrot.slane %v559_v4, %v1819_v9  ;;  %v592_v7 = vadd.f32 %v590_v45, %v588_v20  ;;  %v2333_v20 = vld [vmem:[#allocation9] sm:$0xf]  ;;  %v1468_v4 = vld [vmem:[#allocation4 + $0x6] sm:$0x3] }
  0xf7   :  { %v445_v23 = vadd.f32 %v444_v16, %v443_v53  ;;  %v690_v39 = vrot.slane %v689_v28, 1  ;;  %v695_v5 = vrot.slane %v694_v11, 2  ;;  %v848_v55 = vrot.slane %v2284_v35, 2 }
  0xf8   :  { %v452_v37 = vadd.f32 %v451_v60, %v450_v48  ;;  %v580_v25 = vrot.slane %v566_v63, %v1819_v9  ;;  %v583_v8 = vmul.f32 %v576_v62, %v1855_v29  ;;  %v593_v14 = vmul.f32 %v576_v62, %v1857_v30 }
  0xf9   :  { %v446_v22 = vrot.slane %v445_v23, 2  ;;  %v691_v0 = vadd.f32 %v690_v39, %v689_v28  ;;  %v696_v50 = vadd.f32 %v695_v5, %v694_v11  ;;  %v849_v21 = vadd.f32 %v848_v55, %v2284_v35  ;;  %v2326_v35 = vld [vmem:[#allocation7] sm:$0xf] }
  0xfa   :  { %v453_v31 = vrot.slane %v452_v37, 2  ;;  %v584_v13 = vmul.f32 %v580_v25, %v1855_v29  ;;  %v585_v26 = vadd.f32 %v583_v8, %v571_v10  ;;  %v594_v58 = vmul.f32 %v580_v25, %v1857_v30 }
  0xfb   :  { %v447_v56 = vadd.f32 %v446_v22, %v445_v23  ;;  %v595_v36 = vadd.f32 %v593_v14, %v591_v46  ;;  %v697_v2 = vrot.slane %v696_v50, 1  ;;  %v850_v17 = vrot.slane %v849_v21, 1 }
  0xfc   :  { %v454_v38 = vadd.f32 %v453_v31, %v452_v37  ;;  %v586_v12 = vadd.f32 %v584_v13, %v572_v47  ;;  %v596_v59 = vadd.f32 %v594_v58, %v592_v7  ;;  %v597_v3 = vmul.f32 %v585_v26, %v2225_v19 }
  0xfd   :  { %v448_v24 = vrot.slane %v447_v56, 1  ;;  %v599_v11 = vmul.f32 %v595_v36, %v2230_v44  ;;  %v698_v42 = vadd.f32 %v697_v2, %v696_v50  ;;  %v727_v29 = vmul.f32 %v2326_v35, %v585_v26 }
  0xfe   :  { %v455_v41 = vrot.slane %v454_v38, 1  ;;  %v598_v30 = vmul.f32 %v586_v12, %v2225_v19  ;;  %v600_v43 = vmul.f32 %v596_v59, %v2230_v44  ;;  %v728_v10 = vmul.f32 %v2326_v35, %v586_v12 }
  0xff   :  { %v449_v18 = vadd.f32 %v448_v24, %v447_v56  ;;  %v601_v40 = vsub.f32 %v597_v3, %v599_v11  ;;  %v701_v47 = vsel %vm221_vm1, %v698_v42, %v691_v0  ;;  %v729_v54 = vmul.f32 %v2333_v20, %v595_v36  ;;  %v1471_v42 = vld [vmem:[#allocation4 + $0xa] sm:$0x3] }
 0x100   :  { %v456_v53 = vadd.f32 %v455_v41, %v454_v38  ;;  %v602_v34 = vsub.f32 %v598_v30, %v600_v43  ;;  %v2336_v45 = vadd.f32 %v1468_v4, %v701_v47  ;;  %v730_v16 = vmul.f32 %v2333_v20, %v596_v59 }
 0x101   :  { %v603_v48 = vsel %vm204_vm0, %v601_v40, 0.0  ;;  %v731_v46 = vsub.f32 %v727_v29, %v729_v54  ;;  %v747_v28 = vmul.f32 %v2326_v35, %v595_v36  ;;  %v748_v60 = vmul.f32 %v2326_v35, %v596_v59  ;;  %v2365_v59 = vld [vmem:[#allocation12] sm:$0xf] }
 0x102   :  { %v459_v63 = vsel %vm221_vm1, %v456_v53, %v449_v18  ;;  %v604_v62 = vrot.slane %v603_v48, 4  ;;  %v610_v7 = vsel %vm204_vm0, %v602_v34, 0.0  ;;  %v711_v23 = vrot.slane %v2336_v45, %v1813_v6 }
 0x103   :  { %v461_v39 = vadd.f32 %v459_v63, %v2265_v27  ;;  %v611_v5 = vrot.slane %v610_v7, 4  ;;  %v732_v55 = vsub.f32 %v728_v10, %v730_v16  ;;  %v749_v37 = vmul.f32 %v2333_v20, %v585_v26 }
 0x104   :  { %v605_v25 = vadd.f32 %v604_v62, %v603_v48  ;;  %v712_v8 = vcombine.high %v711_v23, %v711_v23  ;;  %v719_v14 = vrot.slane %v711_v23, %v1813_v6  ;;  %v750_v22 = vmul.f32 %v2333_v20, %v586_v12 }
 0x105   :  { %463 = vst [vmem:[#allocation16 + $0x2] sm:$0x3] %v461_v39  ;;  %v612_v0 = vadd.f32 %v611_v5, %v610_v7  ;;  %v751_v50 = vadd.f32 %v749_v37, %v747_v28  ;;  %v851_v31 = vadd.f32 %v850_v17, %v849_v21  ;;  %v854_v13 = vadd.f32 %v853_v49, %v2131_v52  ;;  %v2362_v52 = vld [vmem:[#allocation10] sm:$0xf] }
 0x106   :  { %v606_v58 = vrot.slane %v605_v25, 2  ;;  %v726_v27 = vrot.slane %v712_v8, %v1813_v6  ;;  %v736_v56 = vrot.slane %v719_v14, %v1819_v9  ;;  %v752_v26 = vadd.f32 %v750_v22, %v748_v60 }
 0x107   :  { %v613_v36 = vrot.slane %v612_v0, 2  ;;  %v855_v2 = vrot.slane %v854_v13, 2  ;;  %v1021_v38 = vsel %vm221_vm1, %v2183_v57, %v2142_v61  ;;  %v1181_v21 = vsel %vm221_vm1, %v2215_v15, %v2159_v32  ;;  %v1472_v61 = vld [vmem:[#allocation4 + $0xc] sm:$0x3] }
 0x108   :  { %v607_v17 = vadd.f32 %v606_v58, %v605_v25  ;;  %v740_v12 = vrot.slane %v726_v27, %v1819_v9  ;;  %v743_v49 = vmul.f32 %v2362_v52, %v736_v56  ;;  %v753_v3 = vmul.f32 %v2365_v59, %v736_v56  ;;  %v1473_v25 = vld [vmem:[#allocation4 + $0x8] sm:$0x3] }
 0x109   :  { %v614_v24 = vadd.f32 %v613_v36, %v612_v0  ;;  %v856_v11 = vadd.f32 %v855_v2, %v854_v13  ;;  %v2368_v29 = vadd.f32 %v1471_v42, %v1021_v38  ;;  %v2370_v57 = vadd.f32 %v1472_v61, %v1181_v21 }
 0x10a   :  { %v608_v32 = vrot.slane %v607_v17, 1  ;;  %v744_v15 = vmul.f32 %v2362_v52, %v740_v12  ;;  %v745_v41 = vadd.f32 %v743_v49, %v731_v46  ;;  %v754_v30 = vmul.f32 %v2365_v59, %v740_v12 }
 0x10b   :  { %v615_v43 = vrot.slane %v614_v24, 1  ;;  %v755_v10 = vadd.f32 %v753_v3, %v751_v50  ;;  %v857_v18 = vrot.slane %v856_v11, 1  ;;  %v2376_v40 = vrot.slane %v2368_v29, %v1813_v6 }
 0x10c   :  { %v609_v47 = vadd.f32 %v608_v32, %v607_v17  ;;  %v746_v54 = vadd.f32 %v744_v15, %v732_v55  ;;  %v756_v53 = vadd.f32 %v754_v30, %v752_v26  ;;  %v757_v34 = vmul.f32 %v745_v41, %v2225_v19 }
 0x10d   :  { %v616_v4 = vadd.f32 %v615_v43, %v614_v24  ;;  %v759_v16 = vmul.f32 %v755_v10, %v2230_v44  ;;  %v858_v48 = vadd.f32 %v857_v18, %v856_v11  ;;  %v887_v46 = vmul.f32 %v2326_v35, %v745_v41 }
 0x10e   :  { %v758_v28 = vmul.f32 %v746_v54, %v2225_v19  ;;  %v760_v60 = vmul.f32 %v756_v53, %v2230_v44  ;;  %v888_v63 = vmul.f32 %v2326_v35, %v746_v54  ;;  %v889_v62 = vmul.f32 %v2333_v20, %v755_v10 }
 0x10f   :  { %v619_v7 = vsel %vm221_vm1, %v616_v4, %v609_v47  ;;  %v761_v23 = vsub.f32 %v757_v34, %v759_v16  ;;  %v861_v39 = vsel %vm221_vm1, %v858_v48, %v851_v31  ;;  %v890_v5 = vmul.f32 %v2333_v20, %v756_v53 }
 0x110   :  { %v621_v55 = vadd.f32 %v619_v7, %v2298_v51  ;;  %v762_v37 = vsub.f32 %v758_v28, %v760_v60  ;;  %v2389_v8 = vadd.f32 %v1473_v25, %v861_v39  ;;  %v891_v14 = vsub.f32 %v887_v46, %v889_v62 }
 0x111   :  { %v763_v22 = vsel %vm204_vm0, %v761_v23, 0.0  ;;  %v892_v0 = vsub.f32 %v888_v63, %v890_v5  ;;  %v907_v50 = vmul.f32 %v2326_v35, %v755_v10  ;;  %v908_v13 = vmul.f32 %v2326_v35, %v756_v53 }
 0x112   :  { %623 = vst [vmem:[#allocation16 + $0x4] sm:$0x3] %v621_v55  ;;  %v764_v58 = vrot.slane %v763_v22, 4  ;;  %v770_v31 = vsel %vm204_vm0, %v762_v37, 0.0  ;;  %v871_v27 = vrot.slane %v2389_v8, %v1813_v6  ;;  %v909_v51 = vmul.f32 %v2333_v20, %v745_v41 }
 0x113   :  { %v771_v56 = vrot.slane %v770_v31, 4  ;;  %v910_v26 = vmul.f32 %v2333_v20, %v746_v54  ;;  %v1039_v36 = vrot.slane %v2376_v40, %v1813_v6  ;;  %v2403_v2 = vrot.slane %v2370_v57, %v1813_v6 }
 0x114   :  { %v765_v38 = vadd.f32 %v764_v58, %v763_v22  ;;  %v872_v21 = vcombine.high %v871_v27, %v871_v27  ;;  %v879_v17 = vrot.slane %v871_v27, %v1813_v6  ;;  %v911_v12 = vadd.f32 %v909_v51, %v907_v50 }
 0x115   :  { %v772_v49 = vadd.f32 %v771_v56, %v770_v31  ;;  %v912_v3 = vadd.f32 %v910_v26, %v908_v13  ;;  %v1056_v24 = vrot.slane %v1039_v36, %v1819_v9  ;;  %v1199_v11 = vrot.slane %v2403_v2, %v1813_v6 }
 0x116   :  { %v766_v42 = vrot.slane %v765_v38, 2  ;;  %v886_v61 = vrot.slane %v872_v21, %v1813_v6  ;;  %v896_v32 = vrot.slane %v879_v17, %v1819_v9  ;;  %v1341_v15 = vsel %vm221_vm1, %v2235_v33, %v2188_v1  ;;  %v1474_v1 = vld [vmem:[#allocation4 + $0xe] sm:$0x3] }
 0x117   :  { %v773_v41 = vrot.slane %v772_v49, 2  ;;  %v1063_v30 = vmul.f32 %v2362_v52, %v1056_v24  ;;  %v1073_v43 = vmul.f32 %v2365_v59, %v1056_v24  ;;  %v1216_v10 = vrot.slane %v1199_v11, %v1819_v9 }
 0x118   :  { %v767_v18 = vadd.f32 %v766_v42, %v765_v38  ;;  %v900_v47 = vrot.slane %v886_v61, %v1819_v9  ;;  %v903_v54 = vmul.f32 %v2362_v52, %v896_v32  ;;  %v913_v53 = vmul.f32 %v2365_v59, %v896_v32 }
 0x119   :  { %v774_v34 = vadd.f32 %v773_v41, %v772_v49  ;;  %v1223_v4 = vmul.f32 %v2362_v52, %v1216_v10  ;;  %v1233_v16 = vmul.f32 %v2365_v59, %v1216_v10  ;;  %v2422_v33 = vadd.f32 %v1474_v1, %v1341_v15 }
 0x11a   :  { %v768_v48 = vrot.slane %v767_v18, 1  ;;  %v904_v46 = vmul.f32 %v2362_v52, %v900_v47  ;;  %v905_v28 = vadd.f32 %v903_v54, %v891_v14  ;;  %v914_v60 = vmul.f32 %v2365_v59, %v900_v47 }
 0x11b   :  { %v775_v63 = vrot.slane %v774_v34, 1  ;;  %v915_v62 = vadd.f32 %v913_v53, %v911_v12  ;;  %v1351_v7 = vrot.slane %v2422_v33, %v1813_v6  ;;  %v1032_v23 = vcombine.high %v2376_v40, %v2376_v40 }
 0x11c   :  { %v769_v39 = vadd.f32 %v768_v48, %v767_v18  ;;  %v906_v5 = vadd.f32 %v904_v46, %v892_v0  ;;  %v916_v55 = vadd.f32 %v914_v60, %v912_v3  ;;  %v1047_v37 = vmul.f32 %v2326_v35, %v905_v28 }
 0x11d   :  { %v776_v25 = vadd.f32 %v775_v63, %v774_v34  ;;  %v1049_v22 = vmul.f32 %v2333_v20, %v915_v62  ;;  %v1067_v14 = vmul.f32 %v2326_v35, %v915_v62  ;;  %v1069_v50 = vmul.f32 %v2333_v20, %v905_v28 }
 0x11e   :  { %v1359_v13 = vrot.slane %v1351_v7, %v1813_v6  ;;  %v1046_v58 = vrot.slane %v1032_v23, %v1813_v6  ;;  %v1048_v31 = vmul.f32 %v2326_v35, %v906_v5  ;;  %v1050_v40 = vmul.f32 %v2333_v20, %v916_v55 }
 0x11f   :  { %v779_v0 = vsel %vm221_vm1, %v776_v25, %v769_v39  ;;  %v1051_v27 = vsub.f32 %v1047_v37, %v1049_v22  ;;  %v1071_v51 = vadd.f32 %v1069_v50, %v1067_v14  ;;  %v1068_v56 = vmul.f32 %v2326_v35, %v916_v55 }
 0x120   :  { %v781_v26 = vadd.f32 %v779_v0, %v2336_v45  ;;  %v1376_v36 = vrot.slane %v1359_v13, %v1819_v9  ;;  %v1052_v38 = vsub.f32 %v1048_v31, %v1050_v40  ;;  %v1060_v21 = vrot.slane %v1046_v58, %v1819_v9 }
 0x121   :  { %v1065_v17 = vadd.f32 %v1063_v30, %v1051_v27  ;;  %v2443_v12 = vadd.f32 %v1073_v43, %v1071_v51  ;;  %v1070_v49 = vmul.f32 %v2333_v20, %v906_v5  ;;  %v1192_v3 = vcombine.high %v2403_v2, %v2403_v2 }
 0x122   :  { %783 = vst [vmem:[#allocation16 + $0x6] sm:$0x3] %v781_v26  ;;  %v1383_v24 = vmul.f32 %v2362_v52, %v1376_v36  ;;  %v1393_v11 = vmul.f32 %v2365_v59, %v1376_v36  ;;  %v1064_v45 = vmul.f32 %v2362_v52, %v1060_v21  ;;  %v1074_v42 = vmul.f32 %v2365_v59, %v1060_v21 }
 0x123   :  { %v1207_v61 = vmul.f32 %v2326_v35, %v1065_v17  ;;  %v1209_v32 = vmul.f32 %v2333_v20, %v2443_v12  ;;  %v1227_v15 = vmul.f32 %v2326_v35, %v2443_v12  ;;  %v1229_v41 = vmul.f32 %v2333_v20, %v1065_v17 }
 0x124   :  { %v1066_v2 = vadd.f32 %v1064_v45, %v1052_v38  ;;  %v1072_v30 = vadd.f32 %v1070_v49, %v1068_v56  ;;  %v1206_v43 = vrot.slane %v1192_v3, %v1813_v6  ;;  %v1352_v10 = vcombine.high %v1351_v7, %v1351_v7 }
 0x125   :  { %v1211_v18 = vsub.f32 %v1207_v61, %v1209_v32  ;;  %v1231_v47 = vadd.f32 %v1229_v41, %v1227_v15  ;;  %v917_v54 = vmul.f32 %v905_v28, %v2225_v19  ;;  %v918_v53 = vmul.f32 %v906_v5, %v2225_v19 }
 0x126   :  { %v1076_v34 = vadd.f32 %v1074_v42, %v1072_v30  ;;  %v1208_v1 = vmul.f32 %v2326_v35, %v1066_v2  ;;  %v1220_v48 = vrot.slane %v1206_v43, %v1819_v9  ;;  %v1230_v46 = vmul.f32 %v2333_v20, %v1066_v2 }
 0x127   :  { %v1225_v60 = vadd.f32 %v1223_v4, %v1211_v18  ;;  %v1235_v63 = vadd.f32 %v1233_v16, %v1231_v47  ;;  %v1366_v23 = vrot.slane %v1352_v10, %v1813_v6  ;;  %v919_v39 = vmul.f32 %v915_v62, %v2230_v44 }
 0x128   :  { %v1210_v7 = vmul.f32 %v2333_v20, %v1076_v34  ;;  %v1224_v37 = vmul.f32 %v2362_v52, %v1220_v48  ;;  %v1228_v28 = vmul.f32 %v2326_v35, %v1076_v34  ;;  %v1234_v5 = vmul.f32 %v2365_v59, %v1220_v48 }
 0x129   :  { %v1367_v25 = vmul.f32 %v2326_v35, %v1225_v60  ;;  %v1369_v22 = vmul.f32 %v2333_v20, %v1235_v63  ;;  %v1387_v14 = vmul.f32 %v2326_v35, %v1235_v63  ;;  %v1389_v4 = vmul.f32 %v2333_v20, %v1225_v60 }
 0x12a   :  { %v1212_v16 = vsub.f32 %v1208_v1, %v1210_v7  ;;  %v1232_v6 = vadd.f32 %v1230_v46, %v1228_v28  ;;  %v1380_v62 = vrot.slane %v1366_v23, %v1819_v9  ;;  %v920_v50 = vmul.f32 %v916_v55, %v2230_v44 }
 0x12b   :  { %v1371_v13 = vsub.f32 %v1367_v25, %v1369_v22  ;;  %v1391_v58 = vadd.f32 %v1389_v4, %v1387_v14  ;;  %v921_v31 = vsub.f32 %v917_v54, %v919_v39  ;;  %v1077_v40 = vmul.f32 %v1065_v17, %v2225_v19 }
 0x12c   :  { %v1226_v0 = vadd.f32 %v1224_v37, %v1212_v16  ;;  %v1236_v27 = vadd.f32 %v1234_v5, %v1232_v6  ;;  %v1384_v51 = vmul.f32 %v2362_v52, %v1380_v62  ;;  %v1394_v56 = vmul.f32 %v2365_v59, %v1380_v62 }
 0x12d   :  { %v1385_v26 = vadd.f32 %v1383_v24, %v1371_v13  ;;  %v1395_v36 = vadd.f32 %v1393_v11, %v1391_v58  ;;  %v922_v38 = vsub.f32 %v918_v53, %v920_v50  ;;  %v923_v21 = vsel %vm204_vm0, %v921_v31, 0.0 }
 0x12e   :  { %v1368_v9 = vmul.f32 %v2326_v35, %v1226_v0  ;;  %v1370_v55 = vmul.f32 %v2333_v20, %v1236_v27  ;;  %v1388_v49 = vmul.f32 %v2326_v35, %v1236_v27  ;;  %v1390_v3 = vmul.f32 %v2333_v20, %v1226_v0 }
 0x12f   :  { %v1397_v17 = vmul.f32 %v1385_v26, %v2225_v19  ;;  %1428 = vst [vmem:[#allocation2 + $0x8] sm:$0xf] %v1385_v26  ;;  %v1399_v52 = vmul.f32 %v1395_v36, %v2230_v44  ;;  %1430 = vst [vmem:[#allocation3 + $0x8] sm:$0xf] %v1395_v36  ;;  %v924_v59 = vrot.slane %v923_v21, 4  ;;  %v930_v24 = vsel %vm204_vm0, %v922_v38, 0.0 }
 0x130   :  { %v1372_v11 = vsub.f32 %v1368_v9, %v1370_v55  ;;  %v1392_v45 = vadd.f32 %v1390_v3, %v1388_v49  ;;  %v931_v42 = vrot.slane %v930_v24, 4  ;;  %v1078_v61 = vmul.f32 %v1066_v2, %v2225_v19 }
 0x131   :  { %v1401_v32 = vsub.f32 %v1397_v17, %v1399_v52  ;;  %v925_v15 = vadd.f32 %v924_v59, %v923_v21  ;;  %v1079_v35 = vmul.f32 %v2443_v12, %v2230_v44  ;;  %v1080_v20 = vmul.f32 %v1076_v34, %v2230_v44 }
 0x132   :  { %v1386_v41 = vadd.f32 %v1384_v51, %v1372_v11  ;;  %v1396_v30 = vadd.f32 %v1394_v56, %v1392_v45  ;;  %v932_v43 = vadd.f32 %v931_v42, %v930_v24  ;;  %v1237_v10 = vmul.f32 %v1225_v60, %v2225_v19 }
 0x133   :  { %v926_v18 = vrot.slane %v925_v15, 2  ;;  %v1081_v47 = vsub.f32 %v1077_v40, %v1079_v35  ;;  %v1082_v54 = vsub.f32 %v1078_v61, %v1080_v20  ;;  %v1238_v53 = vmul.f32 %v1226_v0, %v2225_v19 }
 0x134   :  { %v1398_v1 = vmul.f32 %v1386_v41, %v2225_v19  ;;  %1429 = vst [vmem:[#allocation2 + $0xc] sm:$0xf] %v1386_v41  ;;  %v1400_v2 = vmul.f32 %v1396_v30, %v2230_v44  ;;  %1431 = vst [vmem:[#allocation3 + $0xc] sm:$0xf] %v1396_v30  ;;  %v933_v48 = vrot.slane %v932_v43, 2  ;;  %v1239_v12 = vmul.f32 %v1235_v63, %v2230_v44 }
 0x135   :  { %v927_v34 = vadd.f32 %v926_v18, %v925_v15  ;;  %v1083_v46 = vsel %vm204_vm0, %v1081_v47, 0.0  ;;  %v1090_v23 = vsel %vm204_vm0, %v1082_v54, 0.0  ;;  %v1240_v60 = vmul.f32 %v1236_v27, %v2230_v44 }
 0x136   :  { %v1402_v39 = vsub.f32 %v1398_v1, %v1400_v2  ;;  %v934_v7 = vadd.f32 %v933_v48, %v932_v43  ;;  %v1084_v37 = vrot.slane %v1083_v46, 4  ;;  %v1091_v28 = vrot.slane %v1090_v23, 4 }
 0x137   :  { %v928_v5 = vrot.slane %v927_v34, 1  ;;  %v1241_v19 = vsub.f32 %v1237_v10, %v1239_v12  ;;  %v1242_v25 = vsub.f32 %v1238_v53, %v1240_v60  ;;  %v1403_v22 = vsel %vm204_vm0, %v1401_v32, 0.0 }
 0x138   :  { %v935_v14 = vrot.slane %v934_v7, 1  ;;  %v1085_v4 = vadd.f32 %v1084_v37, %v1083_v46  ;;  %v1092_v16 = vadd.f32 %v1091_v28, %v1090_v23  ;;  %v1404_v63 = vrot.slane %v1403_v22, 4 }
 0x139   :  { %v929_v6 = vadd.f32 %v928_v5, %v927_v34  ;;  %v1243_v62 = vsel %vm204_vm0, %v1241_v19, 0.0  ;;  %v1250_v50 = vsel %vm204_vm0, %v1242_v25, 0.0  ;;  %v1410_v44 = vsel %vm204_vm0, %v1402_v39, 0.0 }
 0x13a   :  { %v936_v13 = vadd.f32 %v935_v14, %v934_v7  ;;  %v1086_v58 = vrot.slane %v1085_v4, 2  ;;  %v1093_v31 = vrot.slane %v1092_v16, 2  ;;  %v1244_v40 = vrot.slane %v1243_v62, 4 }
 0x13b   :  { %v1251_v0 = vrot.slane %v1250_v50, 4  ;;  %v1405_v27 = vadd.f32 %v1404_v63, %v1403_v22  ;;  %v1411_v51 = vrot.slane %v1410_v44, 4 }
 0x13c   :  { %v939_v56 = vsel %vm221_vm1, %v936_v13, %v929_v6  ;;  %v1087_v26 = vadd.f32 %v1086_v58, %v1085_v4  ;;  %v1094_v36 = vadd.f32 %v1093_v31, %v1092_v16  ;;  %v1245_v38 = vadd.f32 %v1244_v40, %v1243_v62 }
 0x13d   :  { %v941_v21 = vadd.f32 %v939_v56, %v2389_v8  ;;  %v1252_v9 = vadd.f32 %v1251_v0, %v1250_v50  ;;  %v1406_v55 = vrot.slane %v1405_v27, 2  ;;  %v1412_v49 = vadd.f32 %v1411_v51, %v1410_v44 }
 0x13e   :  { %v1088_v3 = vrot.slane %v1087_v26, 1  ;;  %v1095_v17 = vrot.slane %v1094_v36, 1  ;;  %v1246_v52 = vrot.slane %v1245_v38, 2 }
 0x13f   :  { %943 = vst [vmem:[#allocation16 + $0x8] sm:$0x3] %v941_v21  ;;  %v1253_v59 = vrot.slane %v1252_v9, 2  ;;  %v1407_v24 = vadd.f32 %v1406_v55, %v1405_v27  ;;  %v1413_v11 = vrot.slane %v1412_v49, 2 }
 0x140   :  { %v1089_v45 = vadd.f32 %v1088_v3, %v1087_v26  ;;  %v1096_v42 = vadd.f32 %v1095_v17, %v1094_v36  ;;  %v1247_v61 = vadd.f32 %v1246_v52, %v1245_v38 }
 0x141   :  { %v1254_v32 = vadd.f32 %v1253_v59, %v1252_v9  ;;  %v1408_v15 = vrot.slane %v1407_v24, 1  ;;  %v1414_v35 = vadd.f32 %v1413_v11, %v1412_v49 }
 0x142   :  { %v1099_v20 = vsel %vm221_vm1, %v1096_v42, %v1089_v45  ;;  %v1248_v41 = vrot.slane %v1247_v61, 1 }
 0x143   :  { %v1101_v8 = vadd.f32 %v1099_v20, %v2368_v29  ;;  %v1255_v30 = vrot.slane %v1254_v32, 1  ;;  %v1415_v43 = vrot.slane %v1414_v35, 1  ;;  %v1409_v47 = vadd.f32 %v1408_v15, %v1407_v24 }
 0x144   :  { %v1249_v10 = vadd.f32 %v1248_v41, %v1247_v61 }
 0x145   :  { %1103 = vst [vmem:[#allocation16 + $0xa] sm:$0x3] %v1101_v8  ;;  %v1256_v18 = vadd.f32 %v1255_v30, %v1254_v32  ;;  %v1416_v54 = vadd.f32 %v1415_v43, %v1414_v35 }
 0x147   :  { %v1259_v53 = vsel %vm221_vm1, %v1256_v18, %v1249_v10  ;;  %v1419_v1 = vsel %vm221_vm1, %v1416_v54, %v1409_v47 }
 0x148   :  { %v1261_v2 = vadd.f32 %v1259_v53, %v2370_v57  ;;  %v1421_v48 = vadd.f32 %v1419_v1, %v2422_v33 }
 0x14a   :  { %1263 = vst [vmem:[#allocation16 + $0xc] sm:$0x3] %v1261_v2  ;;  %1423 = vst [vmem:[#allocation16 + $0xe] sm:$0x3] %v1421_v48 }
 0x14b   :  { %1645 = shalt.err (!%p1642_p4)
}
 0x14c   :  { %s1646_s16 = scalar_lea.hbm %s2533_s7, 256 }
 0x14d   :  { %p1647_p5 = scmp.ne.s32.totalorder %s2533_s7, %s1646_s16  ;;  %p1650_p6 = scmp.lt.u32.totalorder %s1646_s16, %s2533_s7 }
 0x14f   :  { %p1652_p7 = pnand %p1650_p6, %p1647_p5 }
 0x151   :  { %1655 = shalt.err (!%p1652_p7)
}
 0x152   :  { %1443 = dma.vmem_to_hbm [thread:$0]  %s1438_s3, 256, %s2533_s7, [#allocation6], %s1672_s5, %s1672_s5, %s1673_s23  }
 0x153   :  { %1664 = dma.done.wait [#allocation6], 256  }
 0x154   :  { %1665 = vsyncadd [#allocation6], 4294967040 }
 0x155   :  { %1447 = vsyncpa [#allocation5], 1 }
 0x156   :  { %1448 = vsyncpa [#allocation8], 1 }
 0x157   :  { %1449 = vsyncpa [#allocation11], 1 }
 0x158   :  { %1450 = vsyncpa [#allocation14], 1 }
 0x159   :  { %1451 = vsyncpa [#allocation6], 1 }

</bundles_post_ra>
